<compile_context>
chip_gen: v5e
topology: v5e:2x2
jax: 0.10.0
libtpu: 0.0.40
codegen_flags: <defaults>
</compile_context>

<pallas_src>
import math
from functools import partial

import jax
import jax.numpy as jnp
from jax.experimental import pallas as pl
from jax.experimental.pallas import tpu as pltpu


# ---------------------------------------------------------------------------
# Kernel 1: fused conv-stem matmul + GroupNorm + SiLU + global-avg-pool + compress linear
# ---------------------------------------------------------------------------

def _encoder_kernel(p_ref, w_ref, gw_ref, gb_ref, avg_ref, sct_ref, cw_ref, cb_ref, o_ref):
    # p_ref: [1, HW, K9] im2col patches for one sample.
    bf16 = jnp.bfloat16
    patches = p_ref[0].astype(jnp.float32)                                       # [HW, K9]
    # conv stem as an MXU matmul (bf16 operands, f32 accumulate); no bias (folded into GN).
    feat = jnp.dot(patches.astype(bf16), w_ref[...].astype(bf16),
                   preferred_element_type=jnp.float32)                           # [HW, C]
    # GroupNorm (two-pass centered variance, biased, eps=1e-5) via tiny group matmuls.
    mean_c = jnp.mean(feat, axis=0, keepdims=True)                               # [1, C]
    gmean = jnp.dot(mean_c, avg_ref[...], preferred_element_type=jnp.float32)    # [1, G]
    gmean_c = jnp.dot(gmean, sct_ref[...], preferred_element_type=jnp.float32)   # [1, C]
    cent = feat - gmean_c
    msq_c = jnp.mean(cent * cent, axis=0, keepdims=True)                         # [1, C]
    gvar = jnp.dot(msq_c, avg_ref[...], preferred_element_type=jnp.float32)      # [1, G]
    gvar_c = jnp.dot(gvar, sct_ref[...], preferred_element_type=jnp.float32)     # [1, C]
    y = cent * jax.lax.rsqrt(gvar_c + 1e-5) * gw_ref[...] + gb_ref[...]
    y = y * jax.nn.sigmoid(y)                                                    # SiLU
    pooled = jnp.mean(y, axis=0, keepdims=True)                                  # [1, C] avg pool
    # compress linear fused into the epilogue (dropout is eval-mode identity).
    out = jnp.dot(pooled.astype(bf16), cw_ref[...].astype(bf16),
                  preferred_element_type=jnp.float32) + cb_ref[...]
    o_ref[0] = out.astype(o_ref.dtype)


def encoder_pallas(patches, w_mat, gn_w, gn_b, avg, sct, comp_w, comp_b):
    """patches: [N, HW, 9*Cin] -> [N, D] fused conv+GN+SiLU+pool+compress, grid over samples."""
    N, HW, K9 = patches.shape
    D = comp_w.shape[1]

    def fullspec(a):
        return pl.BlockSpec(a.shape, lambda n, _nd=a.ndim: (0,) * _nd)

    out = pl.pallas_call(
        _encoder_kernel,
        grid=(N,),
        in_specs=[pl.BlockSpec((1, HW, K9), lambda n: (n, 0, 0))] +
                 [fullspec(a) for a in (w_mat, gn_w, gn_b, avg, sct, comp_w, comp_b)],
        out_specs=pl.BlockSpec((1, 1, D), lambda n: (n, 0, 0)),
        out_shape=jax.ShapeDtypeStruct((N, 1, D), jnp.float32),
        compiler_params=pltpu.CompilerParams(dimension_semantics=("parallel",)),
    )(patches, w_mat, gn_w, gn_b, avg, sct, comp_w, comp_b)
    return out[:, 0, :]


# ---------------------------------------------------------------------------
# Kernel 2: whole transformer stack + token mean-pool + head linear in one pallas_call
# ---------------------------------------------------------------------------

def _transformer_stack_kernel(tok_ref, posori_ref,
                              ln1w_ref, ln1b_ref, wqkv_ref, bqkv_ref, wo_ref, bo_ref,
                              ln2w_ref, ln2b_ref, w1_ref, b1_ref, w2_ref, b2_ref,
                              hwt_ref, hwp_ref, hb_ref,
                              o_ref, x_scr, *, num_heads, B, T):
    l = pl.program_id(0)
    D = x_scr.shape[-1]
    BT = B * T
    dh = D // num_heads
    scale = 1.0 / math.sqrt(dh)
    bf16 = jnp.bfloat16

    @pl.when(l == 0)
    def _():
        x_scr[...] = tok_ref[...].reshape(BT, D).astype(jnp.float32)

    def layer_norm(v, w, b):
        mu = jnp.mean(v, axis=-1, keepdims=True)
        c = v - mu
        var = jnp.mean(c * c, axis=-1, keepdims=True)
        return c * jax.lax.rsqrt(var + 1e-5) * w + b

    x = x_scr[...]                                                               # [BT, D] f32

    # --- self-attention block (pre-norm); B folded into M for all projections ---
    h1 = layer_norm(x, ln1w_ref[0], ln1b_ref[0])
    qkv = jnp.dot(h1.astype(bf16), wqkv_ref[0].astype(bf16),
                  preferred_element_type=jnp.float32) + bqkv_ref[0]              # [BT, 3D]
    q3 = qkv[:, :D].reshape(B, T, D)
    k3 = qkv[:, D:2 * D].reshape(B, T, D)
    v3 = qkv[:, 2 * D:].reshape(B, T, D)
    proj = jnp.zeros((BT, D), jnp.float32)
    for hh in range(num_heads):
        sl = slice(hh * dh, (hh + 1) * dh)
        qh = q3[:, :, sl] * scale
        kh = k3[:, :, sl]
        vh = v3[:, :, sl]
        s = jnp.einsum('btd,bsd->bts', qh, kh, preferred_element_type=jnp.float32)   # [B,T,T]
        s = s - jnp.max(s, axis=-1, keepdims=True)
        e = jnp.exp(s)
        p = e * pl.reciprocal(jnp.sum(e, axis=-1, keepdims=True), approx=True)
        oh = jnp.einsum('bts,bsd->btd', p, vh, preferred_element_type=jnp.float32)   # [B,T,dh]
        # accumulate through the matching rows of the output projection (no head concat)
        proj = proj + jnp.dot(oh.reshape(BT, dh).astype(bf16),
                              wo_ref[0][sl, :].astype(bf16),
                              preferred_element_type=jnp.float32)
    x = x + proj + bo_ref[0]

    # --- feed-forward block (pre-norm, exact erf GELU) ---
    h2 = layer_norm(x, ln2w_ref[0], ln2b_ref[0])
    f1 = jnp.dot(h2.astype(bf16), w1_ref[0].astype(bf16),
                 preferred_element_type=jnp.float32) + b1_ref[0]
    g = 0.5 * f1 * (1.0 + jax.lax.erf(f1 * 0.7071067811865476))
    f2 = jnp.dot(g.astype(bf16), w2_ref[0].astype(bf16),
                 preferred_element_type=jnp.float32) + b2_ref[0]
    x = x + f2
    x_scr[...] = x

    # --- epilogue at last layer: mean over tokens + head linear (concat split into two matmuls)
    @pl.when(l == pl.num_programs(0) - 1)
    def _():
        rb = jax.lax.broadcasted_iota(jnp.int32, (B, BT), 0)
        cb = jax.lax.broadcasted_iota(jnp.int32, (B, BT), 1)
        pool_mat = jnp.where(cb // T == rb, 1.0 / T, 0.0).astype(jnp.float32)    # [B, BT]
        pooled = jnp.dot(pool_mat, x, preferred_element_type=jnp.float32)        # [B, D]
        head = (jnp.dot(pooled.astype(bf16), hwt_ref[...].astype(bf16),
                        preferred_element_type=jnp.float32)
                + jnp.dot(posori_ref[...], hwp_ref[...],
                          preferred_element_type=jnp.float32)
                + hb_ref[...])
        o_ref[...] = head.astype(o_ref.dtype)


def transformer_stack_pallas(tokens, stack, posori, head_w_tok, head_w_pos, head_b, num_heads):
    """tokens: [B, T, D]; stacked per-layer weights with leading layer axis; returns [B, D]."""
    B, T, D = tokens.shape
    order = ("ln1_w", "ln1_b", "wqkv", "bqkv", "wo", "bo",
             "ln2_w", "ln2_b", "w1", "b1", "w2", "b2")
    weights = [stack[k] for k in order]
    L = weights[0].shape[0]

    def lspec(a):
        return pl.BlockSpec((1,) + a.shape[1:],
                            lambda l, _nd=a.ndim: (l,) + (0,) * (_nd - 1))

    def fullspec(a):
        return pl.BlockSpec(a.shape, lambda l, _nd=a.ndim: (0,) * _nd)

    return pl.pallas_call(
        partial(_transformer_stack_kernel, num_heads=num_heads, B=B, T=T),
        grid=(L,),
        in_specs=[fullspec(tokens), fullspec(posori)] + [lspec(w) for w in weights] +
                 [fullspec(head_w_tok), fullspec(head_w_pos), fullspec(head_b)],
        out_specs=pl.BlockSpec((B, D), lambda l: (0, 0)),
        out_shape=jax.ShapeDtypeStruct((B, D), jnp.float32),
        scratch_shapes=[pltpu.VMEM((B * T, D), jnp.float32)],
        compiler_params=pltpu.CompilerParams(dimension_semantics=("arbitrary",)),
    )(tokens, posori, *weights, head_w_tok, head_w_pos, head_b)


# ---------------------------------------------------------------------------
# glue (plain JAX)
# ---------------------------------------------------------------------------

def _im2col_3x3_s2(x_nhwc):
    # TODO(synk): for large Cin the tap gather should move in-kernel; at Cin=3/6 the patch slab
    # is small relative to the fused-away [N, HW, C] feature map so a JAX-side im2col is cheap.
    N, H, W, Cin = x_nhwc.shape
    Ho, Wo = H // 2, W // 2
    xp = jnp.pad(x_nhwc, ((0, 0), (1, 1), (1, 1), (0, 0)))
    cols = []
    for di in range(3):
        for dj in range(3):
            cols.append(xp[:, di:di + 2 * Ho:2, dj:dj + 2 * Wo:2, :])
    patches = jnp.concatenate(cols, axis=-1)                    # [N, Ho, Wo, 9*Cin]
    return patches.reshape(N, Ho * Wo, 9 * Cin)


def _encode_images(x_nchw, conv_w, gn_w, gn_b, comp_w_t, comp_b, features_per_group=16):
    # TODO(synk): the full EfficientNet-b0 backbone (external efficientnet_pytorch dependency) is
    # stubbed with one conv stem + GroupNorm + SiLU + global-avg-pool, mirroring
    # extract_features -> _avg_pooling -> flatten; dropout is eval-mode identity.
    x = jnp.transpose(x_nchw, (0, 2, 3, 1))                     # NCHW -> NHWC
    Cin = x.shape[-1]
    Cout = conv_w.shape[0]
    patches = _im2col_3x3_s2(x)                                 # [N, HW, 9*Cin]
    w_mat = jnp.transpose(conv_w, (2, 3, 1, 0)).reshape(9 * Cin, Cout)
    G = Cout // features_per_group
    gid = jnp.arange(Cout) // features_per_group
    sct = (gid[None, :] == jnp.arange(G)[:, None]).astype(jnp.float32)   # [G, C] one-hot
    avg = sct.T / float(features_per_group)                              # [C, G] group-average
    return encoder_pallas(patches, w_mat, gn_w, gn_b, avg, sct, comp_w_t, comp_b)   # [N, D]


def init_params(key, context_size=2, obs_encoding_size=128, num_heads=2, num_layers=2,
                ff_factor=4, stem_channels=256):
    D = obs_encoding_size
    C = stem_channels
    FF = ff_factor * D
    ks = list(jax.random.split(key, 64))
    it = iter(ks)

    def nrm(shape, scale=0.02):
        return (scale * jax.random.normal(next(it), shape)).astype(jnp.float32)

    p = {}
    # obs encoder stub (in_channels=3) and floorplan encoder stub (in_channels=6)
    p["obs_conv_w"] = nrm((C, 3, 3, 3))                         # PyTorch [Cout, Cin, kh, kw]
    p["obs_gn_w"] = jnp.ones((1, C), jnp.float32)
    p["obs_gn_b"] = jnp.zeros((1, C), jnp.float32)
    p["fp_conv_w"] = nrm((C, 6, 3, 3))
    p["fp_gn_w"] = jnp.ones((1, C), jnp.float32)
    p["fp_gn_b"] = jnp.zeros((1, C), jnp.float32)
    # compress linears (num_features != obs_encoding_size)
    p["compress_obs_w"] = nrm((D, C)); p["compress_obs_b"] = jnp.zeros((1, D), jnp.float32)
    p["compress_fp_w"] = nrm((D, C)); p["compress_fp_b"] = jnp.zeros((1, D), jnp.float32)
    # positional encoding buffer (max_seq_len = context_size + 2)
    T = context_size + 2
    pos = jnp.arange(T, dtype=jnp.float32)[:, None]
    div = jnp.exp(jnp.arange(0, D, 2, dtype=jnp.float32) * (-math.log(10000.0) / D))
    pe = jnp.zeros((T, D), jnp.float32)
    pe = pe.at[:, 0::2].set(jnp.sin(pos * div)).at[:, 1::2].set(jnp.cos(pos * div))
    p["pos_enc"] = pe
    # transformer encoder layers (pre-norm, exact gelu), stacked along a leading layer axis
    layers = []
    for _ in range(num_layers):
        in_proj_w = nrm((3 * D, D))                             # PyTorch [3D, D]
        in_proj_b = jnp.zeros((3 * D,), jnp.float32)
        out_proj_w = nrm((D, D))
        lp = {
            "ln1_w": jnp.ones((1, D), jnp.float32), "ln1_b": jnp.zeros((1, D), jnp.float32),
            "wqkv": in_proj_w.T, "bqkv": in_proj_b[None, :],
            "wo": out_proj_w.T, "bo": jnp.zeros((1, D), jnp.float32),
            "ln2_w": jnp.ones((1, D), jnp.float32), "ln2_b": jnp.zeros((1, D), jnp.float32),
            "w1": nrm((FF, D)).T, "b1": jnp.zeros((1, FF), jnp.float32),
            "w2": nrm((D, FF)).T, "b2": jnp.zeros((1, D), jnp.float32),
        }
        layers.append(lp)
    p["sa_stack"] = {k: jnp.stack([lp[k] for lp in layers], axis=0) for k in layers[0]}
    # final obs_goal_pos_ori_enc: Linear(D + 6, D), split so the concat becomes two matmuls
    head_w = nrm((D, D + 6))
    p["head_w_tok"] = head_w[:, :D].T                           # [D, D]
    p["head_w_pos"] = head_w[:, D:].T                           # [6, D]
    p["head_b"] = jnp.zeros((1, D), jnp.float32)
    return p


def flona_vint_forward(params, obs_img, floorplan_img, obs_pos, goal_pos, obs_ori,
                       context_size=2, obs_encoding_size=128, num_heads=2):
    D = obs_encoding_size
    B = obs_img.shape[0]
    obs_goal_pos_ori = jnp.concatenate([obs_pos, goal_pos, obs_ori], axis=1)        # [B, 6]

    # floorplan branch: last obs frame (3 ch) + floorplan (3 ch) -> 6-channel encoder
    obsfloorplan_img = jnp.concatenate(
        [obs_img[:, 3 * context_size:, :, :], floorplan_img], axis=1)
    fp_enc = _encode_images(obsfloorplan_img, params["fp_conv_w"],
                            params["fp_gn_w"], params["fp_gn_b"],
                            params["compress_fp_w"].T, params["compress_fp_b"])     # [B, D]
    fp_enc = fp_enc[:, None, :]                                                     # [B, 1, D]

    # obs branch: split context frames along channel dim, stack along batch
    frames = jnp.split(obs_img, context_size + 1, axis=1)
    obs_stack = jnp.concatenate(frames, axis=0)                                     # [(ctx+1)*B, 3, H, W]
    obs_enc = _encode_images(obs_stack, params["obs_conv_w"],
                             params["obs_gn_w"], params["obs_gn_b"],
                             params["compress_obs_w"].T, params["compress_obs_b"])  # [(ctx+1)*B, D]
    obs_enc = jnp.transpose(obs_enc.reshape(context_size + 1, B, D), (1, 0, 2))     # [B, ctx+1, D]

    tokens = jnp.concatenate([obs_enc, fp_enc], axis=1)                             # [B, ctx+2, D]
    tokens = tokens + params["pos_enc"][None, :tokens.shape[1], :]                  # PositionalEncoding

    # fused transformer stack + mean-pool + head linear
    return transformer_stack_pallas(tokens, params["sa_stack"], obs_goal_pos_ori,
                                    params["head_w_tok"], params["head_w_pos"],
                                    params["head_b"], num_heads)


if __name__ == "__main__":
    context_size = 2
    B, H, W = 2, 16, 16
    key = jax.random.PRNGKey(0)
    k_param, k_obs, k_fp, k_p1, k_p2, k_p3 = jax.random.split(key, 6)

    params = init_params(k_param, context_size=context_size)
    obs_img = jax.random.normal(k_obs, (B, 3 * (context_size + 1), H, W), jnp.float32)
    floorplan_img = jax.random.normal(k_fp, (B, 3, H, W), jnp.float32)
    obs_pos = jax.random.normal(k_p1, (B, 2), jnp.float32)
    goal_pos = jax.random.normal(k_p2, (B, 2), jnp.float32)
    obs_ori = jax.random.normal(k_p3, (B, 2), jnp.float32)

    out = flona_vint_forward(params, obs_img, floorplan_img, obs_pos, goal_pos, obs_ori,
                             context_size=context_size)
    out = jax.block_until_ready(out)
    assert out.shape == (B, 128) and out.dtype == jnp.float32
    assert bool(jnp.all(jnp.isfinite(out)))
    print("KERNEL_OK")
</pallas_src>

<mosaic_0001>
module attributes {stable_mosaic.version = 11 : i64} {
  func.func @_encoder_kernel(%arg0: i32, %arg1: memref<1x64x54xf32, #tpu.memory_space<vmem>>, %arg2: memref<54x256xf32, #tpu.memory_space<vmem>>, %arg3: memref<1x256xf32, #tpu.memory_space<vmem>>, %arg4: memref<1x256xf32, #tpu.memory_space<vmem>>, %arg5: memref<256x16xf32, #tpu.memory_space<vmem>>, %arg6: memref<16x256xf32, #tpu.memory_space<vmem>>, %arg7: memref<256x128xf32, #tpu.memory_space<vmem>>, %arg8: memref<1x128xf32, #tpu.memory_space<vmem>>, %arg9: memref<1x1x128xf32, #tpu.memory_space<vmem>>) attributes {dimension_semantics = [#tpu.dimension_semantics<parallel>], iteration_bounds = array<i64: 2>, scalar_prefetch = 0 : i64, scratch_operands = 0 : i64, tpu.core_type = #tpu.core_type<tc>, window_params = [{transform_indices = @transform_0, window_bounds = array<i64: 1, 64, 54>}, {pipeline_mode = #tpu.pipeline_mode<synchronous>, transform_indices = @transform_1, window_bounds = array<i64: 54, 256>}, {pipeline_mode = #tpu.pipeline_mode<synchronous>, transform_indices = @transform_2, window_bounds = array<i64: 1, 256>}, {pipeline_mode = #tpu.pipeline_mode<synchronous>, transform_indices = @transform_3, window_bounds = array<i64: 1, 256>}, {pipeline_mode = #tpu.pipeline_mode<synchronous>, transform_indices = @transform_4, window_bounds = array<i64: 256, 16>}, {pipeline_mode = #tpu.pipeline_mode<synchronous>, transform_indices = @transform_5, window_bounds = array<i64: 16, 256>}, {pipeline_mode = #tpu.pipeline_mode<synchronous>, transform_indices = @transform_6, window_bounds = array<i64: 256, 128>}, {pipeline_mode = #tpu.pipeline_mode<synchronous>, transform_indices = @transform_7, window_bounds = array<i64: 1, 128>}, {transform_indices = @transform_8, window_bounds = array<i64: 1, 1, 128>}]} {
    %c0 = arith.constant 0 : index
    %c0_0 = arith.constant 0 : index
    %c0_1 = arith.constant 0 : index
    %0 = vector.load %arg1[%c0, %c0_0, %c0_1] : memref<1x64x54xf32, #tpu.memory_space<vmem>>, vector<1x64x54xf32>
    %1 = vector.shape_cast %0 : vector<1x64x54xf32> to vector<64x54xf32>
    %2 = arith.truncf %1 : vector<64x54xf32> to vector<64x54xbf16>
    %c0_2 = arith.constant 0 : index
    %c0_3 = arith.constant 0 : index
    %3 = vector.load %arg2[%c0_2, %c0_3] : memref<54x256xf32, #tpu.memory_space<vmem>>, vector<54x256xf32>
    %4 = arith.truncf %3 : vector<54x256xf32> to vector<54x256xbf16>
    %cst = arith.constant dense<0.000000e+00> : vector<64x256xf32>
    %5 = tpu.matmul %2, %4, %cst {dimension_numbers = #tpu.dot_dimension_numbers<[1], [0], [0], [1], [0, 0, 1, 1], [], []>} : vector<64x54xbf16>, vector<54x256xbf16>, vector<64x256xf32> -> vector<64x256xf32>
    %cst_4 = arith.constant dense<0.000000e+00> : vector<256xf32>
    %6 = vector.multi_reduction <add>, %5, %cst_4 [0] : vector<64x256xf32> to vector<256xf32>
    %7 = vector.shape_cast %6 : vector<256xf32> to vector<1x256xf32>
    %cst_5 = arith.constant 6.400000e+01 : f32
    %8 = vector.broadcast %cst_5 : f32 to vector<1x256xf32>
    %9 = arith.divf %7, %8 : vector<1x256xf32>
    %c0_6 = arith.constant 0 : index
    %c0_7 = arith.constant 0 : index
    %10 = vector.load %arg5[%c0_6, %c0_7] : memref<256x16xf32, #tpu.memory_space<vmem>>, vector<256x16xf32>
    %cst_8 = arith.constant dense<0.000000e+00> : vector<1x16xf32>
    %11 = tpu.matmul %9, %10, %cst_8 {dimension_numbers = #tpu.dot_dimension_numbers<[1], [0], [0], [1], [0, 0, 1, 1], [], []>} : vector<1x256xf32>, vector<256x16xf32>, vector<1x16xf32> -> vector<1x16xf32>
    %c0_9 = arith.constant 0 : index
    %c0_10 = arith.constant 0 : index
    %12 = vector.load %arg6[%c0_9, %c0_10] : memref<16x256xf32, #tpu.memory_space<vmem>>, vector<16x256xf32>
    %cst_11 = arith.constant dense<0.000000e+00> : vector<1x256xf32>
    %13 = tpu.matmul %11, %12, %cst_11 {dimension_numbers = #tpu.dot_dimension_numbers<[1], [0], [0], [1], [0, 0, 1, 1], [], []>} : vector<1x16xf32>, vector<16x256xf32>, vector<1x256xf32> -> vector<1x256xf32>
    %14 = vector.broadcast %13 : vector<1x256xf32> to vector<64x256xf32>
    %15 = arith.subf %5, %14 : vector<64x256xf32>
    %16 = arith.mulf %15, %15 : vector<64x256xf32>
    %cst_12 = arith.constant dense<0.000000e+00> : vector<256xf32>
    %17 = vector.multi_reduction <add>, %16, %cst_12 [0] : vector<64x256xf32> to vector<256xf32>
    %18 = vector.shape_cast %17 : vector<256xf32> to vector<1x256xf32>
    %cst_13 = arith.constant 6.400000e+01 : f32
    %19 = vector.broadcast %cst_13 : f32 to vector<1x256xf32>
    %20 = arith.divf %18, %19 : vector<1x256xf32>
    %c0_14 = arith.constant 0 : index
    %c0_15 = arith.constant 0 : index
    %21 = vector.load %arg5[%c0_14, %c0_15] : memref<256x16xf32, #tpu.memory_space<vmem>>, vector<256x16xf32>
    %cst_16 = arith.constant dense<0.000000e+00> : vector<1x16xf32>
    %22 = tpu.matmul %20, %21, %cst_16 {dimension_numbers = #tpu.dot_dimension_numbers<[1], [0], [0], [1], [0, 0, 1, 1], [], []>} : vector<1x256xf32>, vector<256x16xf32>, vector<1x16xf32> -> vector<1x16xf32>
    %c0_17 = arith.constant 0 : index
    %c0_18 = arith.constant 0 : index
    %23 = vector.load %arg6[%c0_17, %c0_18] : memref<16x256xf32, #tpu.memory_space<vmem>>, vector<16x256xf32>
    %cst_19 = arith.constant dense<0.000000e+00> : vector<1x256xf32>
    %24 = tpu.matmul %22, %23, %cst_19 {dimension_numbers = #tpu.dot_dimension_numbers<[1], [0], [0], [1], [0, 0, 1, 1], [], []>} : vector<1x16xf32>, vector<16x256xf32>, vector<1x256xf32> -> vector<1x256xf32>
    %cst_20 = arith.constant 9.99999974E-6 : f32
    %25 = vector.broadcast %cst_20 : f32 to vector<1x256xf32>
    %26 = arith.addf %24, %25 : vector<1x256xf32>
    %27 = math.rsqrt %26 : vector<1x256xf32>
    %28 = vector.broadcast %27 : vector<1x256xf32> to vector<64x256xf32>
    %29 = arith.mulf %15, %28 : vector<64x256xf32>
    %c0_21 = arith.constant 0 : index
    %c0_22 = arith.constant 0 : index
    %30 = vector.load %arg3[%c0_21, %c0_22] : memref<1x256xf32, #tpu.memory_space<vmem>>, vector<1x256xf32>
    %31 = vector.broadcast %30 : vector<1x256xf32> to vector<64x256xf32>
    %32 = arith.mulf %29, %31 : vector<64x256xf32>
    %c0_23 = arith.constant 0 : index
    %c0_24 = arith.constant 0 : index
    %33 = vector.load %arg4[%c0_23, %c0_24] : memref<1x256xf32, #tpu.memory_space<vmem>>, vector<1x256xf32>
    %34 = vector.broadcast %33 : vector<1x256xf32> to vector<64x256xf32>
    %35 = arith.addf %32, %34 : vector<64x256xf32>
    %36 = arith.negf %35 : vector<64x256xf32>
    %37 = math.exp %36 : vector<64x256xf32>
    %cst_25 = arith.constant 1.000000e+00 : f32
    %38 = vector.broadcast %cst_25 : f32 to vector<64x256xf32>
    %39 = arith.addf %38, %37 : vector<64x256xf32>
    %40 = arith.divf %38, %39 : vector<64x256xf32>
    %41 = arith.mulf %35, %40 : vector<64x256xf32>
    %cst_26 = arith.constant dense<0.000000e+00> : vector<256xf32>
    %42 = vector.multi_reduction <add>, %41, %cst_26 [0] : vector<64x256xf32> to vector<256xf32>
    %43 = vector.shape_cast %42 : vector<256xf32> to vector<1x256xf32>
    %cst_27 = arith.constant 6.400000e+01 : f32
    %44 = vector.broadcast %cst_27 : f32 to vector<1x256xf32>
    %45 = arith.divf %43, %44 : vector<1x256xf32>
    %46 = arith.truncf %45 : vector<1x256xf32> to vector<1x256xbf16>
    %c0_28 = arith.constant 0 : index
    %c0_29 = arith.constant 0 : index
    %47 = vector.load %arg7[%c0_28, %c0_29] : memref<256x128xf32, #tpu.memory_space<vmem>>, vector<256x128xf32>
    %48 = arith.truncf %47 : vector<256x128xf32> to vector<256x128xbf16>
    %cst_30 = arith.constant dense<0.000000e+00> : vector<1x128xf32>
    %49 = tpu.matmul %46, %48, %cst_30 {dimension_numbers = #tpu.dot_dimension_numbers<[1], [0], [0], [1], [0, 0, 1, 1], [], []>} : vector<1x256xbf16>, vector<256x128xbf16>, vector<1x128xf32> -> vector<1x128xf32>
    %c0_31 = arith.constant 0 : index
    %c0_32 = arith.constant 0 : index
    %50 = vector.load %arg8[%c0_31, %c0_32] : memref<1x128xf32, #tpu.memory_space<vmem>>, vector<1x128xf32>
    %51 = arith.addf %49, %50 : vector<1x128xf32>
    %c0_33 = arith.constant 0 : index
    %c0_34 = arith.constant 0 : index
    %c0_35 = arith.constant 0 : index
    %52 = vector.load %arg9[%c0_33, %c0_34, %c0_35] : memref<1x1x128xf32, #tpu.memory_space<vmem>>, vector<1x1x128xf32>
    %53 = vector.shape_cast %52 : vector<1x1x128xf32> to vector<1x128xf32>
    %54 = vector.shape_cast %51 : vector<1x128xf32> to vector<1x1x128xf32>
    tpu.vector_store %arg9[%c0_33, %c0_34, %c0_35], %54 {strides = array<i32>} : memref<1x1x128xf32, #tpu.memory_space<vmem>>, vector<1x1x128xf32>,
    return
  }
  func.func @transform_0(%arg0: i32) -> (i32, i32, i32) {
    %c0_i32 = arith.constant 0 : i32
    %c0_i32_0 = arith.constant 0 : i32
    %c0_i32_1 = arith.constant 0 : i32
    return %arg0, %c0_i32, %c0_i32_0 : i32, i32, i32
  }
  func.func @transform_1(%arg0: i32) -> (i32, i32) {
    %c0_i32 = arith.constant 0 : i32
    %c0_i32_0 = arith.constant 0 : i32
    %c0_i32_1 = arith.constant 0 : i32
    return %c0_i32, %c0_i32_0 : i32, i32
  }
  func.func @transform_2(%arg0: i32) -> (i32, i32) {
    %c0_i32 = arith.constant 0 : i32
    %c0_i32_0 = arith.constant 0 : i32
    %c0_i32_1 = arith.constant 0 : i32
    return %c0_i32, %c0_i32_0 : i32, i32
  }
  func.func @transform_3(%arg0: i32) -> (i32, i32) {
    %c0_i32 = arith.constant 0 : i32
    %c0_i32_0 = arith.constant 0 : i32
    %c0_i32_1 = arith.constant 0 : i32
    return %c0_i32, %c0_i32_0 : i32, i32
  }
  func.func @transform_4(%arg0: i32) -> (i32, i32) {
    %c0_i32 = arith.constant 0 : i32
    %c0_i32_0 = arith.constant 0 : i32
    %c0_i32_1 = arith.constant 0 : i32
    return %c0_i32, %c0_i32_0 : i32, i32
  }
  func.func @transform_5(%arg0: i32) -> (i32, i32) {
    %c0_i32 = arith.constant 0 : i32
    %c0_i32_0 = arith.constant 0 : i32
    %c0_i32_1 = arith.constant 0 : i32
    return %c0_i32, %c0_i32_0 : i32, i32
  }
  func.func @transform_6(%arg0: i32) -> (i32, i32) {
    %c0_i32 = arith.constant 0 : i32
    %c0_i32_0 = arith.constant 0 : i32
    %c0_i32_1 = arith.constant 0 : i32
    return %c0_i32, %c0_i32_0 : i32, i32
  }
  func.func @transform_7(%arg0: i32) -> (i32, i32) {
    %c0_i32 = arith.constant 0 : i32
    %c0_i32_0 = arith.constant 0 : i32
    %c0_i32_1 = arith.constant 0 : i32
    return %c0_i32, %c0_i32_0 : i32, i32
  }
  func.func @transform_8(%arg0: i32) -> (i32, i32, i32) {
    %c0_i32 = arith.constant 0 : i32
    %c0_i32_0 = arith.constant 0 : i32
    %c0_i32_1 = arith.constant 0 : i32
    return %arg0, %c0_i32, %c0_i32_0 : i32, i32, i32
  }
}

</mosaic_0001>

<bundles_post_ra>
// kernel: tpu_custom_call.1
= control target key start
LH: loop header
LB: loop body
LE: loop exit
PB: predicated region body
PF: predicated region fallthrough
CT: control target
= control target key end

     0   :  { %13 = vsyncpa [#allocation3], 0  ;;  %s2552_s0 = inlined_call_operand.vmem [shape: f32[2,64,54], index: 0, kind: input, shape index: {}]   ;;  %s2553_s1 = inlined_call_operand.vmem [shape: f32[54,256], index: 1, kind: input, shape index: {}]   ;;  %s2554_s2 = inlined_call_operand.vmem [shape: f32[1,256], index: 2, kind: input, shape index: {}]   ;;  %s2555_s3 = inlined_call_operand.vmem [shape: f32[1,256], index: 3, kind: input, shape index: {}]   ;;  %s2556_s4 = inlined_call_operand.vmem [shape: f32[256,16], index: 4, kind: input, shape index: {}]   ;;  %s2557_s5 = inlined_call_operand.vmem [shape: f32[16,256], index: 5, kind: input, shape index: {}]   ;;  %s2558_s6 = inlined_call_operand.vmem [shape: f32[256,128], index: 6, kind: input, shape index: {}]   ;;  %s2559_s7 = inlined_call_operand.vmem [shape: f32[1,128], index: 7, kind: input, shape index: {}]   ;;  %s2560_s8 = inlined_call_operand.hbm [shape: f32[2,1,128], index: 8, kind: output, shape index: {}]  }
   0x1   :  { %15 = vsyncpa [#allocation3 + $0x1], 0  ;;  %s1549_s27 = smov 0   ;;  %s1551_s28 = smov 0  }
   0x2   :  { %s1553_s29 = smov 0   ;;  %s1555_s30 = smov 0  }
   0x3 LB: > { %s1570_s9 = sadd.s32 4294967295, %s1501_s30   ;;  %s1292_s10 = sadd.s32 4294967294, %s1501_s30   ;;  %s1501_s30 = sphi %s1555_s30, %s2614_s30   ;;  %s1497_s29 = sphi %s1553_s29, %s2613_s29   ;;  %s1493_s28 = sphi %s1551_s28, %s2612_s28   ;;  %s1489_s27 = sphi %s1549_s27, %s2611_s27  }
   0x4   : > { %s1574_s11 = sadd.s32 1, %s1501_s30   ;;  %s201_s12 = sadd.s32 1, %s1497_s29 }
   0x5   : > { %s198_s13 = ssub.s32 %s1501_s30, %s1574_s11  ;;  %p211_p0 = scmp.ne.s32.totalorder %s1497_s29, %s1493_s28 }
   0x6   : > { %p199_p1 = scmp.eq.s32.totalorder %s198_s13, 0  ;;  %p212_p2 = scmp.eq.s32.totalorder %s1570_s9, 1 }
   0x7   : > { %p217_p3 = scmp.ne.s32.totalorder %s1493_s28, %s1489_s27  ;;  %p218_p4 = scmp.eq.s32.totalorder %s1292_s10, 1 }
   0x8   : > { %s1585_s14 = scalar_select %p199_p1, %s1497_s29, %s201_s12  }
   0x9   : > { %p1587_p5 = por %p212_p2, %p211_p0  ;;  %p1591_p6 = por %p218_p4, %p217_p3 }
   0xa   : > { %p1295_p7 = scmp.ge.s32.totalorder %s1501_s30, 1  ;;  %p265_p8 = scmp.lt.s32.totalorder %s1501_s30, 3 }
   0xc   : > { %p266_p9 = pnand %p1295_p7, %p265_p8 }
   0xd   : > { %p298_p10 = scmp.lt.s32.totalorder (!%p266_p9), %s1570_s9, 1  ;;  %s1233_s24 = scalar_lea.hbm (!%p266_p9), %s2560_s8, %s1570_s9 }
   0xe   : > { %269 = sbr.rel (%p266_p9) target bundleno = 1070 (0x42e), region = 52  ;;  %s1237_s17 = sshll.u32 (!%p266_p9), %s1233_s24, 4  ;;  %s1238_s17 = int_to_ptr.hbm [resolvable:$true] %s1237_s17 }
   0xf   : > { %s1453_s19 = sshra.s32 (!%p266_p9), %s1238_s17, 4  ;;  %s1459_s22 = scalar_lea.hbm (!%p266_p9), %s2560_s8, 2  ;;  %s1454_s19 = int_to_ptr.hbm [resolvable:$true] %s1453_s19 }
  0x10   : > { %s1455_s20 = scalar_lea.hbm (!%p266_p9), %s1454_s19, 1  ;;  %p1460_p0 = scmp.lt.s32.totalorder (!%p266_p9), %s1454_s19, %s2560_s8 }
  0x11   : > { %p1456_p11 = scmp.ne.s32.totalorder (!%p266_p9), %s1454_s19, %s1455_s20  ;;  %p1461_p1 = scmp.lt.s32.totalorder (!%p266_p9), %s1459_s22, %s1455_s20 }
  0x13   : > { %v328_v0 = vld [vmem:[%s2553_s1 + $0x60] sm:$0x3f]  ;;  %vm351_vm0 = vcmask 1042432   ;;  %v329_v1 = vld [vmem:[%s2553_s1 + $0x68] sm:$0x3f]  ;;  %v326_v5 = vld [vmem:[%s2553_s1 + $0x50] sm:$0xff]  ;;  %p1457_p12 = pnand %p1456_p11, %p1587_p5  ;;  %p1462_p2 = por %p1461_p1, %p1460_p0 }
  0x14   : > { %v324_v2 = vld [vmem:[%s2553_s1 + $0x40] sm:$0xff]  ;;  %v336_v3 = vpack.c.bf16 %v328_v0, %v328_v0  ;;  %v337_v4 = vpack.c.bf16 %v329_v1, %v329_v1  ;;  %v325_v6 = vld [vmem:[%s2553_s1 + $0x48] sm:$0xff]  ;;  %v327_v7 = vld [vmem:[%s2553_s1 + $0x58] sm:$0xff]  ;;  %s299_s13 = scalar_select %p298_p10, %s1570_s9, 1  ;;  %vm338_vm1 = vcmask 441344   ;;  %vm527_vm3 = vcmask 130048  }
  0x15   : > { %v334_v10 = vpack.c.bf16 %v326_v5, %v324_v2  ;;  %v335_v11 = vpack.c.bf16 %v327_v7, %v325_v6  ;;  %v320_v12 = vld [vmem:[%s2553_s1 + $0x20] sm:$0xff]  ;;  %v322_v13 = vld [vmem:[%s2553_s1 + $0x30] sm:$0xff]  ;;  %v321_v14 = vld [vmem:[%s2553_s1 + $0x28] sm:$0xff]  ;;  %p1458_p13 = pneg %p1457_p12 }
  0x16   : > { %v353_v8 = vsel %vm351_vm0, %v336_v3, 0  ;;  %v356_v9 = vsel %vm351_vm0, %v337_v4, 0  ;;  %v323_v15 = vld [vmem:[%s2553_s1 + $0x38] sm:$0xff]  ;;  %s1328_s25 = sshll.u32 %s299_s13, 6  ;;  %v332_v16 = vpack.c.bf16 %v322_v13, %v320_v12  ;;  %v316_v18 = vld [vmem:[%s2553_s1] sm:$0xff]  ;;  %v318_v19 = vld [vmem:[%s2553_s1 + $0x10] sm:$0xff] }
  0x17   : > { %362 = vmatpush.bf16.msra.mxu0 %v353_v8  ;;  %391 = vmatpush.bf16.msra.mxu1 %v356_v9  ;;  %v333_v17 = vpack.c.bf16 %v323_v15, %v321_v14  ;;  %v317_v20 = vld [vmem:[%s2553_s1 + $0x8] sm:$0xff]  ;;  %v319_v21 = vld [vmem:[%s2553_s1 + $0x18] sm:$0xff]  ;;  %s302_s23 = scalar_lea.vmem %s2552_s0, %s1328_s25  ;;  %v330_v22 = vpack.c.bf16 %v318_v19, %v316_v18  ;;  %v1663_v38 = vld [vmem:[%s2556_s4 + $0x70] sm:$0xff]  ;;  %s296_s13 = sand.u32 1, %s1493_s28  }
  0x18   : > { %v331_v23 = vpack.c.bf16 %v319_v21, %v317_v20  ;;  %v304_v24 = vld [vmem:[%s302_s23] sm:$0xff]  ;;  %v305_v25 = vld [vmem:[%s302_s23 + $0x8] sm:$0xff]  ;;  %v306_v27 = vld [vmem:[%s302_s23 + $0x10] sm:$0xff]  ;;  %s297_s10 = scalar_lea.vmem [#allocation2], %s296_s13  ;;  %s1225_s18 = scalar_lea.sflag [#allocation3], %s296_s13 }
  0x19   : > { %v312_v26 = vpack.c.bf16 %v305_v25, %v304_v24  ;;  %v307_v28 = vld [vmem:[%s302_s23 + $0x18] sm:$0xff]  ;;  %v308_v30 = vld [vmem:[%s302_s23 + $0x20] sm:$0xff]  ;;  %v309_v31 = vld [vmem:[%s302_s23 + $0x28] sm:$0xff]  ;;  %s1235_s12 = sshll.u32 %s297_s10, 4  ;;  %p1463_p3 = pnand %p1462_p2, %p1458_p13  ;;  %s1236_s12 = int_to_ptr.vmem [resolvable:$true] %s1235_s12 }
  0x1a   : > { %v313_v29 = vpack.c.bf16 %v307_v28, %v306_v27  ;;  %v314_v32 = vpack.c.bf16 %v309_v31, %v308_v30  ;;  %v310_v33 = vld [vmem:[%s302_s23 + $0x30] sm:$0xff]  ;;  %v311_v34 = vld [vmem:[%s302_s23 + $0x38] sm:$0xff]  ;;  %v1673_v40 = vld [vmem:[%s2556_s4 + $0x68] sm:$0xff] }
  0x1b   : > { %363 = vmatpush.bf16.msra.mxu0 %v334_v10  ;;  %392 = vmatpush.bf16.msra.mxu1 %v335_v11  ;;  %v315_v35 = vpack.c.bf16 %v311_v34, %v310_v33  ;;  %v1655_v36 = vld [vmem:[%s2556_s4 + $0x78] sm:$0xff]  ;;  %v481_v39 = vld [vmem:[%s2556_s4 + $0xf0] sm:$0xff]  ;;  %v480_v41 = vld [vmem:[%s2556_s4 + $0xe8] sm:$0xff] }
  0x1c   : > { %v482_v37 = vld [vmem:[%s2556_s4 + $0xf8] sm:$0xff]  ;;  %v1681_v42 = vld [vmem:[%s2556_s4 + $0x60] sm:$0xff]  ;;  %v1699_v46 = vld [vmem:[%s2556_s4 + $0x50] sm:$0xff] }
  0x1d   : > { %653 = vmatpush.msra.mxu3 %v482_v37  ;;  %v479_v43 = vld [vmem:[%s2556_s4 + $0xe0] sm:$0xff]  ;;  %v1691_v44 = vld [vmem:[%s2556_s4 + $0x58] sm:$0xff]  ;;  %v477_v47 = vld [vmem:[%s2556_s4 + $0xd0] sm:$0xff] }
  0x1e   : > { %v478_v45 = vld [vmem:[%s2556_s4 + $0xd8] sm:$0xff]  ;;  %v1713_v50 = vld [vmem:[%s2556_s4 + $0x48] sm:$0xff]  ;;  %v1721_v52 = vld [vmem:[%s2556_s4 + $0x40] sm:$0xff] }
  0x1f   : > { %364 = vmatpush.bf16.msra.mxu0 %v332_v16  ;;  %393 = vmatpush.bf16.msra.mxu1 %v333_v17  ;;  %v476_v51 = vld [vmem:[%s2556_s4 + $0xc8] sm:$0xff]  ;;  %v475_v53 = vld [vmem:[%s2556_s4 + $0xc0] sm:$0xff]  ;;  %v1735_v56 = vld [vmem:[%s2556_s4 + $0x38] sm:$0xff]  ;;  %v1503_v16 = vmov 64.0  }
  0x20   : > { %654 = vmatpush.msra.mxu3 %v481_v39  ;;  %v474_v57 = vld [vmem:[%s2556_s4 + $0xb8] sm:$0xff]  ;;  %v1743_v58 = vld [vmem:[%s2556_s4 + $0x30] sm:$0xff]  ;;  %v1757_v62 = vld [vmem:[%s2556_s4 + $0x28] sm:$0xff]  ;;  %1369 = vrcp.f32 %v1503_v16 }
  0x21   : > { %v473_v59 = vld [vmem:[%s2556_s4 + $0xb0] sm:$0xff]  ;;  %v472_v63 = vld [vmem:[%s2556_s4 + $0xa8] sm:$0xff]  ;;  %v1765_v0 = vld [vmem:[%s2556_s4 + $0x20] sm:$0xff] }
  0x22   : > { %655 = vmatpush.msra.mxu3 %v480_v41  ;;  %v471_v1 = vld [vmem:[%s2556_s4 + $0xa0] sm:$0xff]  ;;  %v1783_v6 = vld [vmem:[%s2556_s4 + $0x18] sm:$0xff]  ;;  %v1792_v8 = vld [vmem:[%s2556_s4 + $0x10] sm:$0xff] }
  0x23   : > { %365 = vmatpush.bf16.msra.mxu0 %v330_v22  ;;  %394 = vmatpush.bf16.msra.mxu1 %v331_v23  ;;  %v470_v7 = vld [vmem:[%s2556_s4 + $0x98] sm:$0xff]  ;;  %v469_v9 = vld [vmem:[%s2556_s4 + $0x90] sm:$0xff]  ;;  %v1800_v10 = vld [vmem:[%s2556_s4 + $0x8] sm:$0xff] }
  0x24   : > { %656 = vmatpush.msra.mxu3 %v479_v43  ;;  %v468_v11 = vld [vmem:[%s2556_s4 + $0x88] sm:$0xff]  ;;  %v1809_v12 = vld [vmem:[%s2556_s4] sm:$0xff] }
  0x25   : > { %v467_v13 = vld [vmem:[%s2556_s4 + $0x80] sm:$0xff] }
  0x26   : > { %1298 = vmatmul.msk.bf16.vlgmr.msra.gmra.mxu0 %vm338_vm1, %v312_v26  ;;  %1302 = vmatmul.msk.bf16.vlgmr.msra.gmra.mxu1 %vm338_vm1, %v312_v26  ;;  %v1370_v23 = vpop.eup %1369 }
  0x27   : > { %483 = vmatpush.msrb.mxu0 %v1655_v36  ;;  %503 = vmatpush.msrb.mxu1 %v482_v37  ;;  %v443_v28 = vmul.f32 64.0, %v1370_v23  ;;  %vm447_vm2 = vweird.f32 %v1370_v23 }
  0x28   : > { %657 = vmatpush.msra.mxu3 %v478_v45 }
  0x29   : > { %484 = vmatpush.msrb.mxu0 %v1663_v38  ;;  %504 = vmatpush.msrb.mxu1 %v481_v39 }
  0x2a   : > { %658 = vmatpush.msra.mxu3 %v477_v47 }
  0x2b   : > { %485 = vmatpush.msrb.mxu0 %v1673_v40  ;;  %505 = vmatpush.msrb.mxu1 %v480_v41 }
  0x2c   : > { %659 = vmatpush.msra.mxu3 %v476_v51 }
  0x2d   : > { %486 = vmatpush.msrb.mxu0 %v1681_v42  ;;  %506 = vmatpush.msrb.mxu1 %v479_v43 }
  0x2e   : > { %660 = vmatpush.msra.mxu3 %v475_v53 }
  0x2f   : > { %487 = vmatpush.msrb.mxu0 %v1691_v44  ;;  %507 = vmatpush.msrb.mxu1 %v478_v45 }
  0x30   : > { %661 = vmatpush.msra.mxu3 %v474_v57 }
  0x31   : > { %488 = vmatpush.msrb.mxu0 %v1699_v46  ;;  %508 = vmatpush.msrb.mxu1 %v477_v47 }
  0x32   : > { %662 = vmatpush.msra.mxu3 %v473_v59 }
  0x33   : > { %489 = vmatpush.msrb.mxu0 %v1713_v50  ;;  %509 = vmatpush.msrb.mxu1 %v476_v51 }
  0x34   : > { %663 = vmatpush.msra.mxu3 %v472_v63 }
  0x35   : > { %490 = vmatpush.msrb.mxu0 %v1721_v52  ;;  %510 = vmatpush.msrb.mxu1 %v475_v53 }
  0x36   : > { %1299 = vmatmul.msk.bf16.gmra.mxu0 %vm338_vm1, %v313_v29  ;;  %1303 = vmatmul.msk.bf16.gmra.mxu1 %vm338_vm1, %v313_v29 }
  0x37   : > { %491 = vmatpush.msrb.mxu0 %v1735_v56  ;;  %511 = vmatpush.msrb.mxu1 %v474_v57 }
  0x38   : > { %664 = vmatpush.msra.mxu3 %v471_v1 }
  0x39   : > { %492 = vmatpush.msrb.mxu0 %v1743_v58  ;;  %512 = vmatpush.msrb.mxu1 %v473_v59 }
  0x3a   : > { %665 = vmatpush.msra.mxu3 %v470_v7 }
  0x3b   : > { %493 = vmatpush.msrb.mxu0 %v1757_v62  ;;  %513 = vmatpush.msrb.mxu1 %v472_v63 }
  0x3c   : > { %666 = vmatpush.msra.mxu3 %v469_v9 }
  0x3d   : > { %494 = vmatpush.msrb.mxu0 %v1765_v0  ;;  %514 = vmatpush.msrb.mxu1 %v471_v1 }
  0x3e   : > { %667 = vmatpush.msra.mxu3 %v468_v11 }
  0x3f   : > { %495 = vmatpush.msrb.mxu0 %v1783_v6  ;;  %515 = vmatpush.msrb.mxu1 %v470_v7 }
  0x40   : > { %668 = vmatpush.msra.mxu3 %v467_v13 }
  0x41   : > { %496 = vmatpush.msrb.mxu0 %v1792_v8  ;;  %516 = vmatpush.msrb.mxu1 %v469_v9 }
  0x43   : > { %497 = vmatpush.msrb.mxu0 %v1800_v10  ;;  %517 = vmatpush.msrb.mxu1 %v468_v11 }
  0x45   : > { %498 = vmatpush.msrb.mxu0 %v1809_v12  ;;  %518 = vmatpush.msrb.mxu1 %v467_v13 }
  0x46   : > { %1300 = vmatmul.msk.bf16.gmra.mxu0 %vm338_vm1, %v314_v32  ;;  %1304 = vmatmul.msk.bf16.gmra.mxu1 %vm338_vm1, %v314_v32 }
  0x56   : > { %1301 = vmatmul.msk.bf16.gmra.mxu0 %vm338_vm1, %v315_v35  ;;  %1305 = vmatmul.msk.bf16.gmra.mxu1 %vm338_vm1, %v315_v35  ;;  %v444_v35 = vsub.f32 1.0, %v443_v28 }
  0x58   : > { %v445_v45 = vmul.f32 %v1370_v23, %v444_v35 }
  0x5a   : > { %v446_v59 = vadd.f32 %v1370_v23, %v445_v45 }
  0x5c   : > { %v1844_v11 = vsel %vm447_vm2, %v1370_v23, %v446_v59  ;;  %v526_v23 = vld [vmem:[%s2557_s5 + $0x18] sm:$0xff] }
  0x5d   : > { %710 = vmatpush.msra.mxu1 %v526_v23 }
  0xa3   : > { %v1706_v48 = vpop.f32.mrf.mxu0  ;;  %v1708_v49 = vpop.f32.mrf.mxu1 }
  0xab   : > { %v1728_v54 = vpop.f32.mrf.mxu0  ;;  %v1730_v55 = vpop.f32.mrf.mxu1 }
  0xac   : > { %v416_v17 = vadd.f32 %v1728_v54, %v1706_v48  ;;  %v429_v18 = vadd.f32 %v1730_v55, %v1708_v49 }
  0xb3   : > { %v1750_v60 = vpop.f32.mrf.mxu0  ;;  %v1752_v61 = vpop.f32.mrf.mxu1 }
  0xb4   : > { %v417_v19 = vadd.f32 %v416_v17, %v1750_v60  ;;  %v430_v20 = vadd.f32 %v429_v18, %v1752_v61 }
  0xbb   : > { %v1772_v2 = vpop.f32.mrf.mxu0  ;;  %v1774_v3 = vpop.f32.mrf.mxu1 }
  0xbc   : > { %v418_v24 = vadd.f32 %v417_v19, %v1772_v2  ;;  %v431_v25 = vadd.f32 %v430_v20, %v1774_v3  ;;  %v525_v19 = vld [vmem:[%s2557_s5 + $0x10] sm:$0xff]  ;;  %v523_v20 = vld [vmem:[%s2557_s5] sm:$0xff] }
  0xbd   : > { %545 = vmatpush.msra.mxu2 %v525_v19  ;;  %690 = vmatpush.msrb.mxu3 %v525_v19 }
  0xbf   : > { %546 = vmatpush.msra.mxu2 %v523_v20  ;;  %691 = vmatpush.msrb.mxu3 %v523_v20 }
  0xc1   : > { %565 = vmatpush.msrb.mxu2 %v526_v23 }
  0xc3   : > { %v1776_v4 = vpop.f32.mrf.mxu0  ;;  %v1778_v5 = vpop.f32.mrf.mxu1 }
  0xc4   : > { %v419_v26 = vadd.f32 %v418_v24, %v1776_v4  ;;  %v432_v27 = vadd.f32 %v431_v25, %v1778_v5  ;;  %v524_v24 = vld [vmem:[%s2557_s5 + $0x8] sm:$0xff] }
  0xc5   : > { %566 = vmatpush.msrb.mxu2 %v524_v24  ;;  %711 = vmatpush.msra.mxu1 %v524_v24 }
  0xcb   : > { %v1815_v14 = vpop.f32.mrf.mxu0  ;;  %v1817_v15 = vpop.f32.mrf.mxu1 }
  0xcc   : > { %v420_v29 = vadd.f32 %v419_v26, %v1815_v14  ;;  %v433_v30 = vadd.f32 %v432_v27, %v1817_v15 }
  0xd3   : > { %v1826_v21 = vpop.f32.mrf.mxu0  ;;  %v1828_v22 = vpop.f32.mrf.mxu1 }
  0xd4   : > { %v421_v31 = vadd.f32 %v420_v29, %v1826_v21  ;;  %v434_v32 = vadd.f32 %v433_v30, %v1828_v22 }
  0xdb   : > { %v1838_v33 = vpop.f32.mrf.mxu0  ;;  %v1840_v34 = vpop.f32.mrf.mxu1 }
  0xdc   : > { %v422_v37 = vadd.f32 %v421_v31, %v1838_v33  ;;  %v435_v39 = vadd.f32 %v434_v32, %v1840_v34 }
  0xde   : > { %v423_v41 = vrot.slane %v422_v37, 4  ;;  %v436_v43 = vrot.slane %v435_v39, 4 }
  0xe0   : > { %v424_v47 = vadd.f32 %v423_v41, %v422_v37  ;;  %v437_v51 = vadd.f32 %v436_v43, %v435_v39 }
  0xe2   : > { %v425_v53 = vrot.slane %v424_v47, 2  ;;  %v438_v57 = vrot.slane %v437_v51, 2 }
  0xe4   : > { %v426_v63 = vadd.f32 %v425_v53, %v424_v47  ;;  %v439_v1 = vadd.f32 %v438_v57, %v437_v51 }
  0xe6   : > { %v427_v7 = vrot.slane %v426_v63, 1  ;;  %v440_v9 = vrot.slane %v439_v1, 1 }
  0xe8   : > { %v428_v13 = vadd.f32 %v427_v7, %v426_v63  ;;  %v441_v16 = vadd.f32 %v440_v9, %v439_v1 }
  0xea   : > { %v449_v17 = vmul.f32 %v1844_v11, %v428_v13  ;;  %v450_v18 = vmul.f32 %v1844_v11, %v441_v16 }
  0xec   : > { %499 = vmatmul.f32.vlgmr.msrb.gmra.mxu0 %v449_v17  ;;  %519 = vmatmul.f32.vlgmr.msrb.gmra.mxu1 %v450_v18 }
 0x169   : > { %v500_v25 = vpop.f32.mrf.mxu0  ;;  %v520_v26 = vpop.f32.mrf.mxu1 }
 0x16a   : > { %v521_v27 = vadd.f32 %v520_v26, %v500_v25 }
 0x16c   : > { %1306 = vmatmul.msk.f32.vlgmr.msra.gmra.mxu2 %vm527_vm3, %v521_v27 }
 0x16d   : > { %633 = vmatpush.msra.mxu2 %v1655_v36 }
 0x16f   : > { %634 = vmatpush.msra.mxu2 %v1663_v38 }
 0x171   : > { %635 = vmatpush.msra.mxu2 %v1673_v40 }
 0x173   : > { %636 = vmatpush.msra.mxu2 %v1681_v42 }
 0x174   : > { %1307 = vmatmul.msk.f32.vlgmr.msrb.gmra.mxu2 %vm527_vm3, %v521_v27 }
 0x175   : > { %637 = vmatpush.msra.mxu2 %v1691_v44 }
 0x177   : > { %638 = vmatpush.msra.mxu2 %v1699_v46 }
 0x179   : > { %639 = vmatpush.msra.mxu2 %v1713_v50 }
 0x17b   : > { %640 = vmatpush.msra.mxu2 %v1721_v52 }
 0x17d   : > { %641 = vmatpush.msra.mxu2 %v1735_v56 }
 0x17f   : > { %642 = vmatpush.msra.mxu2 %v1743_v58 }
 0x181   : > { %643 = vmatpush.msra.mxu2 %v1757_v62 }
 0x183   : > { %644 = vmatpush.msra.mxu2 %v1765_v0 }
 0x185   : > { %645 = vmatpush.msra.mxu2 %v1783_v6 }
 0x187   : > { %646 = vmatpush.msra.mxu2 %v1792_v8 }
 0x189   : > { %647 = vmatpush.msra.mxu2 %v1800_v10 }
 0x18b   : > { %648 = vmatpush.msra.mxu2 %v1809_v12 }
 0x1ef   : > { %v548_v36 = vpop.f32.mrf.mxu2 }
 0x1f0   : > { %v571_v38 = vperm.slane %v548_v36, 0 }
 0x1f2   : > { %v1879_v40 = vsub.f32 %v1706_v48, %v571_v38  ;;  %v1882_v42 = vsub.f32 %v1728_v54, %v571_v38  ;;  %v1885_v44 = vsub.f32 %v1750_v60, %v571_v38  ;;  %v1888_v46 = vsub.f32 %v1772_v2, %v571_v38 }
 0x1f3   : > { %v1895_v56 = vsub.f32 %v1776_v4, %v571_v38  ;;  %v1900_v60 = vsub.f32 %v1815_v14, %v571_v38  ;;  %v1905_v6 = vsub.f32 %v1826_v21, %v571_v38  ;;  %v1919_v28 = vsub.f32 %v1838_v33, %v571_v38 }
 0x1f4   : > { %v589_v50 = vmul.f32 %v1879_v40, %v1879_v40  ;;  %v591_v52 = vmul.f32 %v1882_v42, %v1882_v42  ;;  %v593_v48 = vmul.f32 %v1885_v44, %v1885_v44  ;;  %v595_v0 = vmul.f32 %v1888_v46, %v1888_v46 }
 0x1f5   : > { %v597_v4 = vmul.f32 %v1895_v56, %v1895_v56  ;;  %v599_v21 = vmul.f32 %v1900_v60, %v1900_v60 }
 0x1f6   : > { %v605_v54 = vadd.f32 %v591_v52, %v589_v50 }
 0x1f7   : > { %v568_v58 = vpop.f32.mrf.mxu2 }
 0x1f8   : > { %v572_v62 = vperm.slane %v568_v58, 0  ;;  %v606_v2 = vadd.f32 %v605_v54, %v593_v48  ;;  %v1178_v48 = vld [vmem:[%s2558_s6 + $0xf0] sm:$0xff]  ;;  %v1179_v54 = vld [vmem:[%s2558_s6 + $0xf8] sm:$0xff]  ;;  %v1176_v58 = vld [vmem:[%s2558_s6 + $0xe0] sm:$0xff] }
 0x1fa   : > { %v607_v8 = vadd.f32 %v606_v2, %v595_v0  ;;  %v1910_v10 = vsub.f32 %v1708_v49, %v572_v62  ;;  %v1913_v12 = vsub.f32 %v1730_v55, %v572_v62  ;;  %v1916_v14 = vsub.f32 %v1752_v61, %v572_v62  ;;  %v1177_v0 = vld [vmem:[%s2558_s6 + $0xe8] sm:$0xff]  ;;  %v1162_v2 = vld [vmem:[%s2558_s6 + $0x70] sm:$0xff] }
 0x1fb   : > { %v1924_v30 = vsub.f32 %v1774_v3, %v572_v62  ;;  %v601_v61 = vmul.f32 %v1905_v6, %v1905_v6  ;;  %v1933_v32 = vsub.f32 %v1778_v5, %v572_v62  ;;  %v603_v3 = vmul.f32 %v1919_v28, %v1919_v28 }
 0x1fc   : > { %v608_v29 = vadd.f32 %v607_v8, %v597_v4  ;;  %v590_v49 = vmul.f32 %v1910_v10, %v1910_v10  ;;  %v592_v55 = vmul.f32 %v1913_v12, %v1913_v12  ;;  %v594_v33 = vmul.f32 %v1916_v14, %v1916_v14  ;;  %v1163_v4 = vld [vmem:[%s2558_s6 + $0x78] sm:$0xff] }
 0x1fd   : > { %v1940_v39 = vsub.f32 %v1817_v15, %v572_v62  ;;  %v596_v41 = vmul.f32 %v1924_v30, %v1924_v30  ;;  %v1945_v47 = vsub.f32 %v1828_v22, %v572_v62  ;;  %v598_v5 = vmul.f32 %v1933_v32, %v1933_v32 }
 0x1fe   : > { %v609_v31 = vadd.f32 %v608_v29, %v599_v21  ;;  %v618_v35 = vadd.f32 %v592_v55, %v590_v49  ;;  %v1950_v57 = vsub.f32 %v1840_v34, %v572_v62  ;;  %v1195_v62 = vpack.c.bf16 %v1179_v54, %v1178_v48  ;;  %v1160_v21 = vld [vmem:[%s2558_s6 + $0x60] sm:$0xff]  ;;  %v1161_v49 = vld [vmem:[%s2558_s6 + $0x68] sm:$0xff]  ;;  %v1174_v55 = vld [vmem:[%s2558_s6 + $0xd0] sm:$0xff] }
 0x1ff   : > { %v600_v15 = vmul.f32 %v1940_v39, %v1940_v39  ;;  %v602_v1 = vmul.f32 %v1945_v47, %v1945_v47  ;;  %v1187_v8 = vpack.c.bf16 %v1163_v4, %v1162_v2  ;;  %v1194_v29 = vpack.c.bf16 %v1177_v0, %v1176_v58  ;;  %v1150_v58 = vld [vmem:[%s2558_s6 + $0x10] sm:$0xff] }
 0x200   : > { %v610_v37 = vadd.f32 %v609_v31, %v601_v61  ;;  %v619_v43 = vadd.f32 %v618_v35, %v594_v33  ;;  %v604_v22 = vmul.f32 %v1950_v57, %v1950_v57  ;;  %v1175_v61 = vld [vmem:[%s2558_s6 + $0xd8] sm:$0xff]  ;;  %v1186_v31 = vpack.c.bf16 %v1161_v49, %v1160_v21  ;;  %v1158_v35 = vld [vmem:[%s2558_s6 + $0x50] sm:$0xff]  ;;  %v2056_v21 = vld [vmem:[%s2555_s3] sm:$0x3] }
 0x201   : > { %1197 = vmatpush.bf16.msrb.mxu2 %v1187_v8  ;;  %v754_v8 = vld [vmem:[%s2554_s2] sm:$0x3]  ;;  %v1165_v49 = vld [vmem:[%s2558_s6 + $0x88] sm:$0xff] }
 0x202   : > { %v611_v45 = vadd.f32 %v610_v37, %v603_v3  ;;  %v620_v51 = vadd.f32 %v619_v43, %v596_v41  ;;  %v1159_v3 = vld [vmem:[%s2558_s6 + $0x58] sm:$0xff]  ;;  %v1193_v41 = vpack.c.bf16 %v1175_v61, %v1174_v55  ;;  %v1172_v43 = vld [vmem:[%s2558_s6 + $0xc0] sm:$0xff] }
 0x204   : > { %v612_v53 = vrot.slane %v611_v45, 4  ;;  %v621_v59 = vadd.f32 %v620_v51, %v598_v5  ;;  %v1185_v5 = vpack.c.bf16 %v1159_v3, %v1158_v35  ;;  %v1156_v51 = vld [vmem:[%s2558_s6 + $0x40] sm:$0xff]  ;;  %v757_v35 = vperm.slane %v754_v8, 1 }
 0x205   : > { %1198 = vmatpush.bf16.msrb.mxu2 %v1186_v31  ;;  %v779_v3 = vperm.slane %v2056_v21, 1 }
 0x206   : > { %v613_v63 = vadd.f32 %v612_v53, %v611_v45  ;;  %v622_v7 = vadd.f32 %v621_v59, %v600_v15  ;;  %v1173_v45 = vld [vmem:[%s2558_s6 + $0xc8] sm:$0xff] }
 0x207   : > { %v1157_v53 = vld [vmem:[%s2558_s6 + $0x48] sm:$0xff]  ;;  %v1192_v59 = vpack.c.bf16 %v1173_v45, %v1172_v43 }
 0x208   : > { %v614_v9 = vrot.slane %v613_v63, 2  ;;  %v623_v13 = vadd.f32 %v622_v7, %v602_v1  ;;  %v1170_v1 = vld [vmem:[%s2558_s6 + $0xb0] sm:$0xff]  ;;  %v1171_v7 = vld [vmem:[%s2558_s6 + $0xb8] sm:$0xff] }
 0x209   : > { %1199 = vmatpush.bf16.msrb.mxu2 %v1185_v5 }
 0x20a   : > { %v615_v16 = vadd.f32 %v614_v9, %v613_v63  ;;  %v624_v17 = vadd.f32 %v623_v13, %v604_v22  ;;  %v1184_v9 = vpack.c.bf16 %v1157_v53, %v1156_v51  ;;  %v1154_v22 = vld [vmem:[%s2558_s6 + $0x30] sm:$0xff]  ;;  %v1155_v13 = vld [vmem:[%s2558_s6 + $0x38] sm:$0xff] }
 0x20c   : > { %v616_v18 = vrot.slane %v615_v16, 1  ;;  %v625_v19 = vrot.slane %v624_v17, 4 }
 0x20d   : > { %1200 = vmatpush.bf16.msrb.mxu2 %v1184_v9 }
 0x20e   : > { %v617_v34 = vadd.f32 %v616_v18, %v615_v16  ;;  %v626_v20 = vadd.f32 %v625_v19, %v624_v17  ;;  %v1191_v18 = vpack.c.bf16 %v1171_v7, %v1170_v1  ;;  %v1168_v19 = vld [vmem:[%s2558_s6 + $0xa0] sm:$0xff] }
 0x210   : > { %v631_v23 = vmul.f32 %v617_v34, %v1844_v11  ;;  %v627_v24 = vrot.slane %v626_v20, 2  ;;  %v1169_v34 = vld [vmem:[%s2558_s6 + $0xa8] sm:$0xff] }
 0x212   : > { %649 = vmatmul.f32.vlgmr.msra.gmra.mxu2 %v631_v23  ;;  %v628_v25 = vadd.f32 %v627_v24, %v626_v20  ;;  %v1183_v20 = vpack.c.bf16 %v1155_v13, %v1154_v22  ;;  %v1152_v24 = vld [vmem:[%s2558_s6 + $0x20] sm:$0xff] }
 0x214   : > { %v629_v26 = vrot.slane %v628_v25, 1  ;;  %1201 = vmatpush.bf16.msrb.mxu2 %v1183_v20 }
 0x216   : > { %v630_v27 = vadd.f32 %v629_v26, %v628_v25  ;;  %v1153_v25 = vld [vmem:[%s2558_s6 + $0x28] sm:$0xff] }
 0x218   : > { %v632_v36 = vmul.f32 %v630_v27, %v1844_v11  ;;  %v1190_v27 = vpack.c.bf16 %v1169_v34, %v1168_v19 }
 0x21a   : > { %669 = vmatmul.f32.vlgmr.msra.gmra.mxu3 %v632_v36 }
 0x21b   : > { %1210 = vmatpush.bf16.msra.mxu3 %v1195_v62  ;;  %v1151_v62 = vld [vmem:[%s2558_s6 + $0x18] sm:$0xff] }
 0x21c   : > { %v1181_v55 = vpack.c.bf16 %v1151_v62, %v1150_v58 }
 0x21f   : > { %1211 = vmatpush.bf16.msra.mxu3 %v1194_v29  ;;  %v1164_v29 = vld [vmem:[%s2558_s6 + $0x80] sm:$0xff] }
 0x223   : > { %1212 = vmatpush.bf16.msra.mxu3 %v1193_v41  ;;  %v1188_v41 = vpack.c.bf16 %v1165_v49, %v1164_v29 }
 0x227   : > { %1213 = vmatpush.bf16.msra.mxu3 %v1192_v59 }
 0x22b   : > { %1214 = vmatpush.bf16.msra.mxu3 %v1191_v18 }
 0x22f   : > { %1215 = vmatpush.bf16.msra.mxu3 %v1190_v27 }
 0x295   : > { %v650_v38 = vpop.f32.mrf.mxu2 }
 0x29d   : > { %v670_v50 = vpop.f32.mrf.mxu3 }
 0x29e   : > { %v671_v52 = vadd.f32 %v670_v50, %v650_v38  ;;  %v1166_v38 = vld [vmem:[%s2558_s6 + $0x90] sm:$0xff]  ;;  %v1167_v50 = vld [vmem:[%s2558_s6 + $0x98] sm:$0xff] }
 0x29f   : > { %v1189_v4 = vpack.c.bf16 %v1167_v50, %v1166_v38 }
 0x2a0   : > { %1308 = vmatmul.msk.f32.vlgmr.msrb.gmra.mxu3 %vm527_vm3, %v671_v52  ;;  %1309 = vmatmul.msk.f32.vlgmr.msra.gmra.mxu1 %vm527_vm3, %v671_v52  ;;  %v1182_v52 = vpack.c.bf16 %v1153_v25, %v1152_v24 }
 0x2a1   : > { %1216 = vmatpush.bf16.msra.mxu3 %v1189_v4 }
 0x2a2   : > { %1202 = vmatpush.bf16.msrb.mxu2 %v1182_v52 }
 0x2a5   : > { %1217 = vmatpush.bf16.msra.mxu3 %v1188_v41 }
 0x2a6   : > { %1203 = vmatpush.bf16.msrb.mxu2 %v1181_v55 }
 0x31d   : > { %v713_v33 = vpop.f32.mrf.mxu1 }
 0x31e   : > { %v714_v37 = vadd.f32 1e-05, %v713_v33 }
 0x320   : > { %1371 = vrsqrt.f32 %v714_v37  ;;  %vm732_vm5 = vweird.f32 %v714_v37 }
 0x323   : > { %v693_v15 = vpop.f32.mrf.mxu3 }
 0x324   : > { %v2010_v63 = vadd.f32 1e-05, %v693_v15 }
 0x326   : > { %v1372_v16 = vpop.eup %1371  ;;  %1373 = vrsqrt.f32 %v2010_v63  ;;  %vm722_vm7 = vweird.f32 %v2010_v63 }
 0x327   : > { %v727_v17 = vmul.f32 %v1372_v16, %v714_v37  ;;  %vm733_vm4 = vweird.f32 %v1372_v16 }
 0x328   : > { %vm734_vm6 = vmor %vm732_vm5, %vm733_vm4 }
 0x329   : > { %v728_v23 = vmul.f32 %v1372_v16, %v727_v17 }
 0x32b   : > { %v729_v26 = vmul.f32 0.5, %v728_v23 }
 0x32c   : > { %v1374_v36 = vpop.eup %1373 }
 0x32d   : > { %v730_v48 = vsub.f32 1.5, %v729_v26  ;;  %v717_v54 = vmul.f32 %v1374_v36, %v2010_v63  ;;  %vm723_vm8 = vweird.f32 %v1374_v36 }
 0x32e   : > { %vm2073_vm9 = vmor %vm722_vm7, %vm723_vm8 }
 0x32f   : > { %v731_v0 = vmul.f32 %v1372_v16, %v730_v48  ;;  %v718_v2 = vmul.f32 %v1374_v36, %v717_v54  ;;  %v756_v48 = vperm.slane %v754_v8, 0 }
 0x331   : > { %v735_v61 = vsel %vm734_vm6, %v1372_v16, %v731_v0  ;;  %v719_v31 = vmul.f32 0.5, %v718_v2 }
 0x332   : > { %v737_v33 = vperm.slane %v735_v61, 0 }
 0x333   : > { %v720_v37 = vsub.f32 1.5, %v719_v31 }
 0x334   : > { %v739_v43 = vmul.f32 %v737_v33, %v1910_v10  ;;  %v741_v45 = vmul.f32 %v737_v33, %v1913_v12  ;;  %v743_v5 = vmul.f32 %v737_v33, %v1916_v14  ;;  %v745_v51 = vmul.f32 %v737_v33, %v1924_v30 }
 0x335   : > { %v721_v53 = vmul.f32 %v1374_v36, %v720_v37  ;;  %v747_v15 = vmul.f32 %v737_v33, %v1933_v32  ;;  %v749_v59 = vmul.f32 %v737_v33, %v1940_v39  ;;  %v751_v1 = vmul.f32 %v737_v33, %v1945_v47 }
 0x336   : > { %v753_v7 = vmul.f32 %v737_v33, %v1950_v57  ;;  %v761_v10 = vmul.f32 %v757_v35, %v739_v43  ;;  %v763_v9 = vmul.f32 %v757_v35, %v741_v45  ;;  %v765_v12 = vmul.f32 %v757_v35, %v743_v5 }
 0x337   : > { %v725_v14 = vsel %vm2073_vm9, %v1374_v36, %v721_v53  ;;  %v767_v30 = vmul.f32 %v757_v35, %v745_v51  ;;  %v769_v22 = vmul.f32 %v757_v35, %v747_v15  ;;  %v771_v32 = vmul.f32 %v757_v35, %v749_v59 }
 0x338   : > { %v773_v13 = vmul.f32 %v757_v35, %v751_v1  ;;  %v775_v39 = vmul.f32 %v757_v35, %v753_v7  ;;  %v2080_v16 = vadd.f32 %v779_v3, %v761_v10  ;;  %v2082_v47 = vadd.f32 %v779_v3, %v763_v9 }
 0x339   : > { %v2084_v17 = vadd.f32 %v779_v3, %v765_v12  ;;  %v2086_v18 = vadd.f32 %v779_v3, %v767_v30  ;;  %v2088_v57 = vadd.f32 %v779_v3, %v769_v22  ;;  %v736_v19 = vperm.slane %v725_v14, 0 }
 0x33a   : > { %v2090_v34 = vadd.f32 %v779_v3, %v771_v32  ;;  %v1311_v20 = vmul.f32 -1.442695, %v2080_v16  ;;  %v2093_v23 = vadd.f32 %v779_v3, %v773_v13  ;;  %v1313_v24 = vmul.f32 -1.442695, %v2082_v47 }
 0x33b   : > { %v1315_v25 = vmul.f32 -1.442695, %v2084_v17  ;;  %v1317_v26 = vmul.f32 -1.442695, %v2086_v18  ;;  %v2098_v27 = vadd.f32 %v779_v3, %v775_v39  ;;  %v1319_v36 = vmul.f32 -1.442695, %v2088_v57 }
 0x33c   : > { %1375 = vpow2.f32 %v1311_v20  ;;  %v1321_v38 = vmul.f32 -1.442695, %v2090_v34  ;;  %v1323_v50 = vmul.f32 -1.442695, %v2093_v23  ;;  %v738_v52 = vmul.f32 %v736_v19, %v1879_v40 }
 0x33d   : > { %1377 = vpow2.f32 %v1313_v24  ;;  %v1325_v54 = vmul.f32 -1.442695, %v2098_v27  ;;  %v740_v58 = vmul.f32 %v736_v19, %v1882_v42  ;;  %v742_v62 = vmul.f32 %v736_v19, %v1885_v44 }
 0x33e   : > { %1379 = vpow2.f32 %v1315_v25  ;;  %v744_v0 = vmul.f32 %v736_v19, %v1888_v46  ;;  %v746_v2 = vmul.f32 %v736_v19, %v1895_v56  ;;  %v748_v29 = vmul.f32 %v736_v19, %v1900_v60 }
 0x33f   : > { %1381 = vpow2.f32 %v1317_v26  ;;  %v750_v49 = vmul.f32 %v736_v19, %v1905_v6  ;;  %v2112_v40 = vperm.slane %v2056_v21, 0  ;;  %v752_v42 = vmul.f32 %v736_v19, %v1919_v28 }
 0x340   : > { %1383 = vpow2.f32 %v1319_v36  ;;  %v760_v44 = vmul.f32 %v756_v48, %v738_v52  ;;  %v762_v56 = vmul.f32 %v756_v48, %v740_v58  ;;  %v764_v31 = vmul.f32 %v756_v48, %v742_v62 }
 0x341   : > { %1385 = vpow2.f32 %v1321_v38  ;;  %v766_v6 = vmul.f32 %v756_v48, %v744_v0  ;;  %v768_v21 = vmul.f32 %v756_v48, %v746_v2  ;;  %v770_v28 = vmul.f32 %v756_v48, %v748_v29 }
 0x342   : > { %v1376_v4 = vpop.eup %1375  ;;  %1387 = vpow2.f32 %v1323_v50  ;;  %v772_v37 = vmul.f32 %v756_v48, %v750_v49  ;;  %v2127_v45 = vmul.f32 %v756_v48, %v752_v42  ;;  %v2132_v51 = vadd.f32 %v2112_v40, %v760_v44 }
 0x343   : > { %v1378_v8 = vpop.eup %1377  ;;  %v2114_v55 = vadd.f32 1.0, %v1376_v4  ;;  %1389 = vpow2.f32 %v1325_v54  ;;  %v2135_v53 = vadd.f32 %v2112_v40, %v762_v56  ;;  %v2139_v1 = vadd.f32 %v2112_v40, %v764_v31 }
 0x344   : > { %v1380_v61 = vpop.eup %1379  ;;  %v2117_v46 = vadd.f32 1.0, %v1378_v8  ;;  %v2142_v63 = vadd.f32 %v2112_v40, %v766_v6  ;;  %v2145_v7 = vadd.f32 %v2112_v40, %v768_v21  ;;  %v2151_v12 = vadd.f32 %v2112_v40, %v770_v28 }
 0x345   : > { %v1382_v33 = vpop.eup %1381  ;;  %v2119_v60 = vadd.f32 1.0, %v1380_v61  ;;  %1391 = vrcp.f32 %v2114_v55  ;;  %v888_v5 = vand.u32 2147483648, %v2114_v55  ;;  %v2154_v14 = vadd.f32 %v2112_v40, %v772_v37 }
 0x346   : > { %v1384_v35 = vpop.eup %1383  ;;  %v2122_v3 = vadd.f32 1.0, %v1382_v33  ;;  %1393 = vrcp.f32 %v2117_v46  ;;  %v918_v59 = vand.u32 2147483648, %v2117_v46  ;;  %vm882_vm10 = vweird.f32 %v2114_v55 }
 0x347   : > { %v1386_v41 = vpop.eup %1385  ;;  %v2125_v43 = vadd.f32 1.0, %v1384_v35  ;;  %1395 = vrcp.f32 %v2119_v60  ;;  %v886_v22 = vand.u32 2147483647, %v2114_v55  ;;  %v948_v32 = vand.u32 2147483648, %v2119_v60 }
 0x348   : > { %v1388_v15 = vpop.eup %1387  ;;  %v2147_v9 = vadd.f32 1.0, %v1386_v41  ;;  %1397 = vrcp.f32 %v2122_v3  ;;  %v889_v20 = vor.u32 1.1754944e-38, %v888_v5  ;;  %vm912_vm11 = vweird.f32 %v2117_v46 }
 0x349   : > { %v1390_v10 = vpop.eup %1389  ;;  %1399 = vrcp.f32 %v2125_v43  ;;  %v2164_v39 = vadd.f32 1.0, %v1388_v15  ;;  %v916_v24 = vand.u32 2147483647, %v2117_v46  ;;  %v919_v36 = vor.u32 1.1754944e-38, %v918_v59 }
 0x34a   : > { %v2170_v25 = vadd.f32 1.0, %v1390_v10  ;;  %v946_v38 = vand.u32 2147483647, %v2119_v60  ;;  %vm942_vm12 = vweird.f32 %v2119_v60  ;;  %v976_v48 = vand.u32 2147483647, %v2122_v3  ;;  %v1148_v10 = vld [vmem:[%s2558_s6] sm:$0xff] }
 0x34b   : > { %v2156_v30 = vpop.eup %1391  ;;  %v978_v54 = vand.u32 2147483648, %v2122_v3  ;;  %1401 = vrcp.f32 %v2147_v9  ;;  %vm2182_vm14 = vcmp.eq.f32.partialorder %v886_v22, 8.507059e+37  ;;  %v949_v2 = vor.u32 1.1754944e-38, %v948_v32 }
 0x34c   : > { %v2162_v13 = vpop.eup %1393  ;;  %v878_v19 = vmul.f32 %v2156_v30, %v2114_v55  ;;  %vm883_vm13 = vweird.f32 %v2156_v30  ;;  %vm972_vm15 = vweird.f32 %v2122_v3  ;;  %vm2192_vm0 = vcmp.eq.f32.partialorder %v916_v24, 8.507059e+37 }
 0x34d   : > { %v908_v26 = vmul.f32 %v2162_v13, %v2117_v46  ;;  %v2175_v50 = vpop.eup %1395  ;;  %vm1002_vm1 = vweird.f32 %v2125_v43  ;;  %v1006_v8 = vand.u32 2147483647, %v2125_v43  ;;  %v1008_v42 = vand.u32 2147483648, %v2125_v43  ;;  %vm2221_vm6 = vmor %vm882_vm10, %vm883_vm13 }
 0x34e   : > { %v879_v52 = vsub.f32 1.0, %v878_v19  ;;  %v938_v0 = vmul.f32 %v2175_v50, %v2119_v60  ;;  %v2189_v4 = vpop.eup %1397  ;;  %vm913_vm2 = vweird.f32 %v2162_v13  ;;  %vm943_vm3 = vweird.f32 %v2175_v50 }
 0x34f   : > { %v909_v62 = vsub.f32 1.0, %v908_v26  ;;  %v1400_v44 = vpop.eup %1399  ;;  %v968_v31 = vmul.f32 %v2189_v4, %v2122_v3  ;;  %vm2205_vm4 = vcmp.eq.f32.partialorder %v946_v38, 8.507059e+37  ;;  %v979_v21 = vor.u32 1.1754944e-38, %v978_v54  ;;  %vm2238_vm9 = vmor %vm912_vm11, %vm913_vm2 }
 0x350   : > { %v880_v29 = vmul.f32 %v2156_v30, %v879_v52  ;;  %v939_v56 = vsub.f32 1.0, %v938_v0  ;;  %v998_v35 = vmul.f32 %v1400_v44, %v2125_v43  ;;  %vm2212_vm5 = vcmp.eq.f32.partialorder %v976_v48, 8.507059e+37  ;;  %vm2253_vm11 = vmor %vm942_vm12, %vm943_vm3 }
 0x351   : > { %v910_v61 = vmul.f32 %v2162_v13, %v909_v62  ;;  %v969_v41 = vsub.f32 1.0, %v968_v31  ;;  %v1036_v15 = vand.u32 2147483647, %v2147_v9  ;;  %v1402_v59 = vpop.eup %1401  ;;  %vm2225_vm7 = vcmp.eq.f32.partialorder %v1006_v8, 8.507059e+37 }
 0x352   : > { %v881_v33 = vadd.f32 %v2156_v30, %v880_v29  ;;  %v940_v37 = vmul.f32 %v2175_v50, %v939_v56  ;;  %v999_v22 = vsub.f32 1.0, %v998_v35  ;;  %v1009_v19 = vor.u32 1.1754944e-38, %v1008_v42 }
 0x353   : > { %v911_v28 = vadd.f32 %v2162_v13, %v910_v61  ;;  %vm1032_vm8 = vweird.f32 %v2147_v9  ;;  %1403 = vrcp.f32 %v2164_v39  ;;  %v970_v38 = vmul.f32 %v2189_v4, %v969_v41 }
 0x354   : > { %v885_v24 = vsel %vm2221_vm6, %v2156_v30, %v881_v33  ;;  %v941_v26 = vadd.f32 %v2175_v50, %v940_v37  ;;  %vm973_vm10 = vweird.f32 %v2189_v4  ;;  %v1000_v48 = vmul.f32 %v1400_v44, %v999_v22 }
 0x355   : > { %v915_v52 = vsel %vm2238_vm9, %v2162_v13, %v911_v28  ;;  %vm1003_vm13 = vweird.f32 %v1400_v44  ;;  %v1028_v30 = vmul.f32 %v1402_v59, %v2147_v9  ;;  %v971_v54 = vadd.f32 %v2189_v4, %v970_v38  ;;  %vm2271_vm12 = vmor %vm972_vm15, %vm973_vm10 }
 0x356   : > { %vm2258_vm2 = vcmp.eq.f32.partialorder %v1036_v15, 8.507059e+37  ;;  %v1038_v13 = vand.u32 2147483648, %v2147_v9  ;;  %v1066_v0 = vand.u32 2147483647, %v2164_v39  ;;  %v890_v29 = vsel %vm2182_vm14, %v889_v20, %v885_v24  ;;  %vm2282_vm14 = vmor %vm1002_vm1, %vm1003_vm13  ;;  %v1149_v9 = vld [vmem:[%s2558_s6 + $0x8] sm:$0xff] }
 0x357   : > { %v945_v60 = vsel %vm2253_vm11, %v2175_v50, %v941_v26  ;;  %v1001_v42 = vadd.f32 %v1400_v44, %v1000_v48  ;;  %v1029_v61 = vsub.f32 1.0, %v1028_v30  ;;  %v920_v56 = vsel %vm2192_vm0, %v919_v36, %v915_v52 }
 0x358   : > { %v975_v58 = vsel %vm2271_vm12, %v2189_v4, %v971_v54  ;;  %v1068_v3 = vand.u32 2147483648, %v2164_v39  ;;  %1405 = vrcp.f32 %v2170_v25  ;;  %vm1033_vm15 = vweird.f32 %v1402_v59 }
 0x359   : > { %v1404_v50 = vpop.eup %1403  ;;  %v1005_v31 = vsel %vm2282_vm14, %v1400_v44, %v1001_v42  ;;  %v1030_v49 = vmul.f32 %v1402_v59, %v1029_v61  ;;  %vm1062_vm0 = vweird.f32 %v2164_v39  ;;  %v950_v36 = vsel %vm2205_vm4, %v949_v2, %v945_v60  ;;  %vm2306_vm3 = vmor %vm1032_vm8, %vm1033_vm15 }
 0x35a   : > { %v1039_v43 = vor.u32 1.1754944e-38, %v1038_v13  ;;  %v1058_v4 = vmul.f32 %v1404_v50, %v2164_v39  ;;  %vm2294_vm1 = vcmp.eq.f32.partialorder %v1066_v0, 8.507059e+37  ;;  %v980_v35 = vsel %vm2212_vm5, %v979_v21, %v975_v58 }
 0x35b   : > { %v1031_v28 = vadd.f32 %v1402_v59, %v1030_v49  ;;  %v1103_v44 = vmul.f32 %v890_v29, %v2080_v16  ;;  %v1105_v37 = vmul.f32 %v920_v56, %v2082_v47  ;;  %v1010_v41 = vsel %vm2225_vm7, %v1009_v19, %v1005_v31 }
 0x35c   : > { %v1059_v6 = vsub.f32 1.0, %v1058_v4  ;;  %vm1063_vm4 = vweird.f32 %v1404_v50  ;;  %v1069_v15 = vor.u32 1.1754944e-38, %v1068_v3  ;;  %v1096_v5 = vand.u32 2147483647, %v2170_v25 }
 0x35d   : > { %v1035_v21 = vsel %vm2306_vm3, %v1402_v59, %v1031_v28  ;;  %v1107_v16 = vmul.f32 %v950_v36, %v2084_v17  ;;  %v1131_v47 = vadd.f32 %v1105_v37, %v1103_v44  ;;  %v1098_v19 = vand.u32 2147483648, %v2170_v25  ;;  %vm1064_vm5 = vmor %vm1062_vm0, %vm1063_vm4 }
 0x35e   : > { %v1406_v22 = vpop.eup %1405  ;;  %v1060_v32 = vmul.f32 %v1404_v50, %v1059_v6  ;;  %v1109_v24 = vmul.f32 %v980_v35, %v2086_v18  ;;  %v1180_v59 = vpack.c.bf16 %v1149_v9, %v1148_v10  ;;  %v1040_v55 = vsel %vm2258_vm2, %v1039_v43, %v1035_v21 }
 0x35f   : > { %v1088_v17 = vmul.f32 %v1406_v22, %v2170_v25  ;;  %v1111_v26 = vmul.f32 %v1010_v41, %v2088_v57  ;;  %v1132_v38 = vadd.f32 %v1131_v47, %v1107_v16  ;;  %v1310_v48 = vmul.f32 -1.442695, %v2132_v51 }
 0x360   : > { %v1061_v52 = vadd.f32 %v1404_v50, %v1060_v32  ;;  %1204 = vmatpush.bf16.msrb.mxu2 %v1180_v59  ;;  %v1312_v30 = vmul.f32 -1.442695, %v2135_v53  ;;  %v1314_v46 = vmul.f32 -1.442695, %v2139_v1  ;;  %vm1093_vm6 = vweird.f32 %v1406_v22 }
 0x361   : > { %v1089_v18 = vsub.f32 1.0, %v1088_v17  ;;  %v1133_v54 = vadd.f32 %v1132_v38, %v1109_v24  ;;  %v1316_v62 = vmul.f32 -1.442695, %v2142_v63  ;;  %v1113_v57 = vmul.f32 %v1040_v55, %v2090_v34 }
 0x362   : > { %v1065_v13 = vsel %vm1064_vm5, %v1404_v50, %v1061_v52  ;;  %1407 = vpow2.f32 %v1310_v48  ;;  %v1318_v0 = vmul.f32 -1.442695, %v2145_v7  ;;  %vm1092_vm7 = vweird.f32 %v2170_v25 }
 0x363   : > { %v1070_v29 = vsel %vm2294_vm1, %v1069_v15, %v1065_v13  ;;  %v1090_v60 = vmul.f32 %v1406_v22, %v1089_v18  ;;  %v1134_v8 = vadd.f32 %v1133_v54, %v1111_v26  ;;  %1409 = vpow2.f32 %v1312_v30  ;;  %vm1094_vm8 = vmor %vm1092_vm7, %vm1093_vm6 }
 0x364   : > { %v2340_v39 = vadd.f32 %v2112_v40, %v2127_v45  ;;  %1411 = vpow2.f32 %v1314_v46  ;;  %v1320_v42 = vmul.f32 -1.442695, %v2151_v12  ;;  %v1115_v34 = vmul.f32 %v1070_v29, %v2093_v23 }
 0x365   : > { %v1091_v61 = vadd.f32 %v1406_v22, %v1090_v60  ;;  %v1135_v56 = vadd.f32 %v1134_v8, %v1113_v57  ;;  %1413 = vpow2.f32 %v1316_v62  ;;  %v1099_v58 = vor.u32 1.1754944e-38, %v1098_v19 }
 0x366   : > { %v1322_v20 = vmul.f32 -1.442695, %v2154_v14  ;;  %vm1097_vm9 = vcmp.eq.f32.partialorder %v1096_v5, 8.507059e+37  ;;  %1415 = vpow2.f32 %v1318_v0  ;;  %v1324_v49 = vmul.f32 -1.442695, %v2340_v39 }
 0x367   : > { %v1095_v3 = vsel %vm1094_vm8, %v1406_v22, %v1091_v61  ;;  %v1136_v25 = vadd.f32 %v1135_v56, %v1115_v34  ;;  %1417 = vpow2.f32 %v1320_v42 }
 0x368   : > { %v1408_v50 = vpop.eup %1407  ;;  %v1100_v40 = vsel %vm1097_vm9, %v1099_v58, %v1095_v3  ;;  %1419 = vpow2.f32 %v1322_v20 }
 0x369   : > { %v1410_v45 = vpop.eup %1409  ;;  %v1117_v31 = vmul.f32 %v1100_v40, %v2098_v27  ;;  %v2348_v23 = vadd.f32 1.0, %v1408_v50 }
 0x36a   : > { %v1412_v36 = vpop.eup %1411  ;;  %v2350_v43 = vadd.f32 1.0, %v1410_v45 }
 0x36b   : > { %v1414_v4 = vpop.eup %1413  ;;  %v1137_v33 = vadd.f32 %v1136_v25, %v1117_v31  ;;  %v2352_v35 = vadd.f32 1.0, %v1412_v36  ;;  %1421 = vrcp.f32 %v2348_v23  ;;  %v873_v5 = vand.u32 2147483648, %v2348_v23 }
 0x36c   : > { %1423 = vrcp.f32 %v2350_v43  ;;  %v1416_v28 = vpop.eup %1415  ;;  %v2356_v27 = vadd.f32 1.0, %v1414_v4  ;;  %v871_v10 = vand.u32 2147483647, %v2348_v23  ;;  %v901_v19 = vand.u32 2147483647, %v2350_v43 }
 0x36d   : > { %v1138_v44 = vrot.slane %v1137_v33, 4  ;;  %1425 = vpow2.f32 %v1324_v49  ;;  %v1418_v37 = vpop.eup %1417  ;;  %v2359_v6 = vadd.f32 1.0, %v1416_v28  ;;  %v903_v24 = vand.u32 2147483648, %v2350_v43 }
 0x36e   : > { %1427 = vrcp.f32 %v2352_v35  ;;  %v1420_v2 = vpop.eup %1419  ;;  %vm867_vm10 = vweird.f32 %v2348_v23  ;;  %vm897_vm13 = vweird.f32 %v2350_v43  ;;  %v2379_v26 = vadd.f32 1.0, %v1418_v37 }
 0x36f   : > { %v1139_v41 = vadd.f32 %v1138_v44, %v1137_v33  ;;  %1429 = vrcp.f32 %v2356_v27  ;;  %v874_v38 = vor.u32 1.1754944e-38, %v873_v5  ;;  %v2381_v48 = vadd.f32 1.0, %v1420_v2 }
 0x370   : > { %1431 = vrcp.f32 %v2359_v6  ;;  %vm2386_vm11 = vcmp.eq.f32.partialorder %v871_v10, 8.507059e+37  ;;  %vm2395_vm2 = vcmp.eq.f32.partialorder %v901_v19, 8.507059e+37  ;;  %v904_v29 = vor.u32 1.1754944e-38, %v903_v24 }
 0x371   : > { %v2361_v15 = vpop.eup %1421  ;;  %v1140_v21 = vrot.slane %v1139_v41, 2  ;;  %v931_v60 = vand.u32 2147483647, %v2352_v35  ;;  %1433 = vrcp.f32 %v2379_v26  ;;  %v933_v3 = vand.u32 2147483648, %v2352_v35 }
 0x372   : > { %v2365_v16 = vpop.eup %1423  ;;  %v863_v47 = vmul.f32 %v2361_v15, %v2348_v23  ;;  %vm868_vm12 = vweird.f32 %v2361_v15  ;;  %v961_v50 = vand.u32 2147483647, %v2356_v27  ;;  %vm927_vm0 = vweird.f32 %v2352_v35 }
 0x373   : > { %v1426_v9 = vpop.eup %1425  ;;  %v1141_v22 = vadd.f32 %v1140_v21, %v1139_v41  ;;  %v893_v32 = vmul.f32 %v2365_v16, %v2350_v43  ;;  %vm898_vm14 = vweird.f32 %v2365_v16  ;;  %vm2415_vm15 = vmor %vm867_vm10, %vm868_vm12  ;;  %vm957_vm1 = vweird.f32 %v2356_v27 }
 0x374   : > { %v864_v59 = vsub.f32 1.0, %v863_v47  ;;  %v2377_v55 = vpop.eup %1427  ;;  %v2383_v30 = vadd.f32 1.0, %v1426_v9  ;;  %vm2428_vm3 = vmor %vm897_vm13, %vm898_vm14  ;;  %vm2438_vm5 = vcmp.eq.f32.partialorder %v931_v60, 8.507059e+37  ;;  %1435 = vrcp.f32 %v2381_v48 }
 0x375   : > { %v1142_v17 = vrot.slane %v1141_v22, 1  ;;  %v894_v52 = vsub.f32 1.0, %v893_v32  ;;  %v923_v54 = vmul.f32 %v2377_v55, %v2352_v35  ;;  %v2392_v62 = vpop.eup %1429  ;;  %vm928_vm4 = vweird.f32 %v2377_v55 }
 0x376   : > { %v865_v46 = vmul.f32 %v2361_v15, %v864_v59  ;;  %v953_v61 = vmul.f32 %v2392_v62, %v2356_v27  ;;  %v2408_v58 = vpop.eup %1431  ;;  %v934_v44 = vor.u32 1.1754944e-38, %v933_v3  ;;  %vm2443_vm6 = vcmp.eq.f32.partialorder %v961_v50, 8.507059e+37  ;;  %vm2453_vm7 = vmor %vm927_vm0, %vm928_vm4 }
 0x377   : > { %v1143_v13 = vadd.f32 %v1142_v17, %v1141_v22  ;;  %v895_v57 = vmul.f32 %v2365_v16, %v894_v52  ;;  %v924_v42 = vsub.f32 1.0, %v923_v54  ;;  %v983_v31 = vmul.f32 %v2408_v58, %v2359_v6 }
 0x378   : > { %v866_v8 = vadd.f32 %v2361_v15, %v865_v46  ;;  %v954_v25 = vsub.f32 1.0, %v953_v61  ;;  %v963_v41 = vand.u32 2147483648, %v2356_v27  ;;  %v991_v2 = vand.u32 2147483647, %v2359_v6 }
 0x379   : > { %v1145_v34 = vmul.f32 %v1143_v13, %v1844_v11  ;;  %v896_v56 = vadd.f32 %v2365_v16, %v895_v57  ;;  %v925_v20 = vmul.f32 %v2377_v55, %v924_v42  ;;  %v984_v43 = vsub.f32 1.0, %v983_v31 }
 0x37a   : > { %v870_v49 = vsel %vm2415_vm15, %v2361_v15, %v866_v8  ;;  %v955_v4 = vmul.f32 %v2392_v62, %v954_v25  ;;  %v1434_v15 = vpop.eup %1433  ;;  %vm958_vm8 = vweird.f32 %v2392_v62  ;;  %vm988_vm9 = vweird.f32 %v2408_v58 }
 0x37b   : > { %v1147_v40 = vpack.c.bf16 %v1145_v34, %v1145_v34  ;;  %v926_v23 = vadd.f32 %v2377_v55, %v925_v20  ;;  %v900_v33 = vsel %vm2428_vm3, %v2365_v16, %v896_v56  ;;  %v875_v21 = vsel %vm2386_vm11, %v874_v38, %v870_v49  ;;  %vm2473_vm13 = vmor %vm957_vm1, %vm958_vm8  ;;  %v1436_v38 = vpop.eup %1435 }
 0x37c   : > { %v956_v16 = vadd.f32 %v2392_v62, %v955_v4  ;;  %v985_v47 = vmul.f32 %v2408_v58, %v984_v43  ;;  %v905_v10 = vsel %vm2395_vm2, %v904_v29, %v900_v33  ;;  %v1013_v35 = vmul.f32 %v1434_v15, %v2379_v26 }
 0x37d   : > { %1218 = vmatmul.bf16.vlgmr.msra.gmra.mxu3 %v1147_v40  ;;  %v930_v9 = vsel %vm2453_vm7, %v2377_v55, %v926_v23  ;;  %vm987_vm10 = vweird.f32 %v2359_v6  ;;  %v993_v32 = vand.u32 2147483648, %v2359_v6  ;;  %1437 = vrcp.f32 %v2383_v30 }
 0x37e   : > { %v986_v22 = vadd.f32 %v2408_v58, %v985_v47  ;;  %v964_v24 = vor.u32 1.1754944e-38, %v963_v41  ;;  %vm2477_vm11 = vcmp.eq.f32.partialorder %v991_v2, 8.507059e+37  ;;  %v1014_v55 = vsub.f32 1.0, %v1013_v35  ;;  %vm2487_vm2 = vmor %vm987_vm10, %vm988_vm9 }
 0x37f   : > { %v1023_v17 = vand.u32 2147483648, %v2379_v26  ;;  %v935_v6 = vsel %vm2438_vm5, %v934_v44, %v930_v9  ;;  %v960_v27 = vsel %vm2473_vm13, %v2392_v62, %v956_v16  ;;  %v1102_v46 = vmul.f32 %v875_v21, %v2132_v51 }
 0x380   : > { %v1104_v18 = vmul.f32 %v905_v10, %v2135_v53  ;;  %v990_v54 = vsel %vm2487_vm2, %v2408_v58, %v986_v22  ;;  %v1015_v13 = vmul.f32 %v1434_v15, %v1014_v55  ;;  %vm1018_vm12 = vweird.f32 %v1434_v15 }
 0x381   : > { %v1043_v57 = vmul.f32 %v1436_v38, %v2381_v48  ;;  %v994_v0 = vor.u32 1.1754944e-38, %v993_v32  ;;  %vm1017_vm14 = vweird.f32 %v2379_v26  ;;  %v1021_v62 = vand.u32 2147483647, %v2379_v26 }
 0x382   : > { %v1051_v29 = vand.u32 2147483647, %v2381_v48  ;;  %v965_v51 = vsel %vm2443_vm6, %v964_v24, %v960_v27  ;;  %v1016_v60 = vadd.f32 %v1434_v15, %v1015_v13  ;;  %v1118_v8 = vadd.f32 %v1104_v18, %v1102_v46  ;;  %vm1019_vm15 = vmor %vm1017_vm14, %vm1018_vm12 }
 0x383   : > { %v1044_v53 = vsub.f32 1.0, %v1043_v57  ;;  %v1438_v42 = vpop.eup %1437  ;;  %v995_v61 = vsel %vm2477_vm11, %v994_v0, %v990_v54  ;;  %v1024_v34 = vor.u32 1.1754944e-38, %v1023_v17  ;;  %v1053_v56 = vand.u32 2147483648, %v2381_v48 }
 0x384   : > { %v1106_v58 = vmul.f32 %v935_v6, %v2139_v1  ;;  %v1020_v20 = vsel %vm1019_vm15, %v1434_v15, %v1016_v60  ;;  %vm1048_vm0 = vweird.f32 %v1436_v38  ;;  %v1073_v3 = vmul.f32 %v1438_v42, %v2383_v30 }
 0x385   : > { %v1045_v26 = vmul.f32 %v1436_v38, %v1044_v53  ;;  %vm1022_vm1 = vcmp.eq.f32.partialorder %v1021_v62, 8.507059e+37  ;;  %vm1047_vm3 = vweird.f32 %v2381_v48  ;;  %v1108_v25 = vmul.f32 %v965_v51, %v2142_v63 }
 0x386   : > { %v1119_v50 = vadd.f32 %v1118_v8, %v1106_v58  ;;  %v1025_v40 = vsel %vm1022_vm1, %v1024_v34, %v1020_v20  ;;  %vm1052_vm4 = vcmp.eq.f32.partialorder %v1051_v29, 8.507059e+37  ;;  %v1074_v31 = vsub.f32 1.0, %v1073_v3  ;;  %vm1049_vm5 = vmor %vm1047_vm3, %vm1048_vm0 }
 0x387   : > { %v1046_v45 = vadd.f32 %v1436_v38, %v1045_v26  ;;  %v1054_v49 = vor.u32 1.1754944e-38, %v1053_v56  ;;  %v1083_v36 = vand.u32 2147483648, %v2383_v30  ;;  %v1110_v1 = vmul.f32 %v995_v61, %v2145_v7 }
 0x388   : > { %v1120_v23 = vadd.f32 %v1119_v50, %v1108_v25  ;;  %v1075_v33 = vmul.f32 %v1438_v42, %v1074_v31  ;;  %vm1078_vm6 = vweird.f32 %v1438_v42  ;;  %v1081_v28 = vand.u32 2147483647, %v2383_v30 }
 0x389   : > { %v1050_v4 = vsel %vm1049_vm5, %v1436_v38, %v1046_v45  ;;  %v1112_v63 = vmul.f32 %v1025_v40, %v2151_v12  ;;  %vm1077_vm7 = vweird.f32 %v2383_v30  ;;  %v1084_v37 = vor.u32 1.1754944e-38, %v1083_v36 }
 0x38a   : > { %v1055_v48 = vsel %vm1052_vm4, %v1054_v49, %v1050_v4  ;;  %v1121_v43 = vadd.f32 %v1120_v23, %v1110_v1  ;;  %v1076_v44 = vadd.f32 %v1438_v42, %v1075_v33  ;;  %vm1079_vm8 = vmor %vm1077_vm7, %vm1078_vm6  ;;  %vm1082_vm9 = vcmp.eq.f32.partialorder %v1081_v28, 8.507059e+37 }
 0x38b   : > { %v1114_v41 = vmul.f32 %v1055_v48, %v2154_v14 }
 0x38c   : > { %v1122_v2 = vadd.f32 %v1121_v43, %v1112_v63  ;;  %v1080_v15 = vsel %vm1079_vm8, %v1438_v42, %v1076_v44 }
 0x38d   : > { %v1085_v7 = vsel %vm1082_vm9, %v1084_v37, %v1080_v15 }
 0x38e   : > { %v1123_v21 = vadd.f32 %v1122_v2, %v1114_v41  ;;  %v1116_v5 = vmul.f32 %v1085_v7, %v2340_v39  ;;  %v1196_v39 = vld [vmem:[%s2559_s7] sm:$0x1] }
 0x390   : > { %v1124_v16 = vadd.f32 %v1123_v21, %v1116_v5 }
 0x392   : > { %v1125_v47 = vrot.slane %v1124_v16, 4 }
 0x394   : > { %v1126_v12 = vadd.f32 %v1125_v47, %v1124_v16 }
 0x396   : > { %v1127_v10 = vrot.slane %v1126_v12, 2 }
 0x398   : > { %v1128_v9 = vadd.f32 %v1127_v10, %v1126_v12 }
 0x39a   : > { %v1129_v35 = vrot.slane %v1128_v9, 1 }
 0x39c   : > { %v1130_v30 = vadd.f32 %v1129_v35, %v1128_v9 }
 0x39e   : > { %v1144_v22 = vmul.f32 %v1130_v30, %v1844_v11 }
 0x3a0   : > { %v1146_v32 = vpack.c.bf16 %v1144_v22, %v1144_v22 }
 0x3a2   : > { %1205 = vmatmul.bf16.vlgmr.msrb.gmra.mxu2 %v1146_v32 }
 0x400   : > { %v1219_v14 = vpop.f32.mrf.mxu3 }
 0x408   : > { %v1221_v19 = vpop.f32.mrf.mxu3 }
 0x425   : > { %v1206_v24 = vpop.f32.mrf.mxu2 }
 0x426   : > { %v1207_v59 = vadd.f32 %v1206_v24, %v1196_v39 }
 0x428   : > { %v1220_v11 = vadd.f32 %v1219_v14, %v1207_v59 }
 0x42a   : > { %1223 = vst [vmem:[%s297_s10] sm:$0x1] %v1220_v11 }
 0x42b   : > { %1466 = shalt.err (!%p1463_p3)
}
 0x42c   : > { %1329 = dma.vmem_to_hbm [thread:$0]  (%p1587_p5), %s1236_s12, 16, %s1238_s17, %s1225_s18  }
 0x42d   : > { %v1208_v55 = vpop.f32.mrf.mxu2 }
 0x42e PF: > { %p1335_p4 = scmp.ge.s32.totalorder %s1501_s30, 2  ;;  %s1249_s13 = sand.u32 1, %s1489_s27  }
 0x42f   : > { %s1250_s24 = scalar_lea.sflag [#allocation3], %s1249_s13 }
 0x430   : > { %p1332_p7 = pnand %p1335_p4, %p1591_p6 }
 0x432   : > { %p1333_p8 = pneg %p1332_p7 }
 0x434   : > { %1484 = dma.done.wait (%p1333_p8), %s1250_s24, 16  }
 0x435   : > { %1486 = vsyncadd (%p1333_p8), %s1250_s24, 4294967280  ;;  %p18_p9 = scmp.ge.s32.totalorder %s1574_s11, 4   ;;  %s2611_s27 = smov %s1493_s28 }
 0x436   : > { %s2612_s28 = smov %s1497_s29  ;;  %s2613_s29 = smov %s1585_s14 }
 0x437   : > { %s2614_s30 = smov %s1574_s11  ;;  %20 = sbr.rel (!%p18_p9) target bundleno = 3 (0x3), region = 87 }
 0x43c   :  { %1255 = vsyncpa [#allocation3], 1 }
 0x43d   :  { %1257 = vsyncpa [#allocation3 + $0x1], 1 }

</bundles_post_ra>
